<compile_context>
chip_gen: v7x
topology: tpu7x:2x2x1
jax: 0.10.0
libtpu: 0.0.40
codegen_flags: <defaults>
</compile_context>

<pallas_src>
import functools

import jax
import jax.numpy as jnp
from jax import lax
from jax.experimental import pallas as pl
from jax.experimental.pallas import tpu as pltpu

LANES = 128
_VMEM_LIMIT = 32 * 1024 * 1024


def _ceil_to(x, m):
    return -(-x // m) * m


def _cparams():
    return pltpu.CompilerParams(
        dimension_semantics=("parallel",),
        vmem_limit_bytes=_VMEM_LIMIT,
    )


# ---------------------------------------------------------------------------
# Kernels
# ---------------------------------------------------------------------------
def _downsample_kernel(x_ref, w_ref, b_ref, o_ref, *, taps, rout, relu_out):
    """4-tap implicit-GEMM for the stride-2 4x4 convs (space-to-depth input)."""
    cout = o_ref.shape[-1]
    acc = jnp.zeros((rout, cout), jnp.float32)
    for t, s in enumerate(taps):
        tap = x_ref[s:s + rout, :].astype(jnp.bfloat16)
        acc = acc + jnp.dot(tap, w_ref[t], preferred_element_type=jnp.float32)
    y = acc + b_ref[...]
    if relu_out:
        y = jnp.maximum(y, 0.0)
    o_ref[...] = y.astype(o_ref.dtype)


def _resblock_kernel(x_ref, w3_ref, b3_ref, w1_ref, b1_ref, o_ref, a_scr,
                     *, wp, g, rout):
    """Fused residual block: ReLU -> 3x3 conv -> ReLU -> 1x1 conv -> + skip."""
    c = o_ref.shape[-1]
    # ReLU applied exactly once per element (into VMEM scratch), not per tap.
    a_scr[...] = jnp.maximum(x_ref[...], 0.0)

    acc = jnp.zeros((rout, c), jnp.float32)
    t = 0
    for di in range(3):
        for dj in range(3):
            s = (di - 1) * wp + (dj - 1)
            tap = a_scr[g + s:g + s + rout, :].astype(jnp.bfloat16)
            acc = acc + jnp.dot(tap, w3_ref[t],
                                preferred_element_type=jnp.float32)
            t += 1

    h1 = jnp.maximum(acc + b3_ref[...], 0.0).astype(jnp.bfloat16)
    y = jnp.dot(h1, w1_ref[...], preferred_element_type=jnp.float32)
    y = y + b1_ref[...] + x_ref[g:g + rout, :]      # skip-add in f32
    o_ref[...] = y.astype(o_ref.dtype)


# ---------------------------------------------------------------------------
# Wrappers (JAX-side layout prep + pallas_call)
# ---------------------------------------------------------------------------
def _downsample_conv(x_nhwc, w_tap, bias, *, relu_out):
    """Conv 4x4, stride 2, reflect pad 1; w_tap: (4, 4*Cin, Cout) bf16."""
    n, h, w, cin = x_nhwc.shape
    cout = w_tap.shape[-1]
    xp = jnp.pad(x_nhwc, ((0, 0), (1, 1), (1, 1), (0, 0)), mode="reflect")
    hp, wp = h + 2, w + 2
    hh, wh = hp // 2, wp // 2
    # space-to-depth: stride-2 4x4 conv -> stride-1 2x2 conv on 4*Cin channels
    xs = xp.reshape(n, hh, 2, wh, 2, cin).transpose(0, 1, 3, 2, 4, 5)
    xs = xs.reshape(n, hh * wh, 4 * cin).astype(jnp.float32)

    f = hh * wh
    rout = _ceil_to(f, 8)
    rin = rout + _ceil_to(wh + 1, 8)
    xs = jnp.pad(xs, ((0, 0), (0, rin - f), (0, 0))).reshape(n * rin, 4 * cin)

    taps = (0, 1, wh, wh + 1)
    kernel = functools.partial(_downsample_kernel, taps=taps, rout=rout,
                               relu_out=relu_out)
    flops = 2 * n * rout * (4 * cin) * cout * 4
    bytes_accessed = int(xs.size * 4 + w_tap.size * 2 + bias.size * 4
                         + n * rout * cout * 4)

    y = pl.pallas_call(
        kernel,
        out_shape=jax.ShapeDtypeStruct((n * rout, cout), jnp.float32),
        grid=(n,),
        in_specs=[
            pl.BlockSpec((rin, 4 * cin), lambda i: (i, 0)),
            pl.BlockSpec((4, 4 * cin, cout), lambda i: (0, 0, 0)),
            pl.BlockSpec((1, cout), lambda i: (0, 0)),
        ],
        out_specs=pl.BlockSpec((rout, cout), lambda i: (i, 0)),
        compiler_params=_cparams(),
        cost_estimate=pl.CostEstimate(flops=flops, transcendentals=0,
                                      bytes_accessed=bytes_accessed),
    )(xs, w_tap, bias)

    y = y.reshape(n, rout, cout)[:, :f].reshape(n, hh, wh, cout)
    return y[:, :hh - 1, :wh - 1, :]                 # (N, H//2, W//2, Cout)


def _residual_block(h_nhwc, w3_tap, b3, w1_mat, b1):
    """Fused residual block on an (N, H, W, C) map, C multiple of 128."""
    n, h, w, c = h_nhwc.shape
    hp_, wp_ = h + 2, w + 2
    p = hp_ * wp_
    g = _ceil_to(wp_ + 1, 8)
    rout = _ceil_to(p, 8)
    rin = rout + 2 * g

    xp = jnp.pad(h_nhwc, ((0, 0), (1, 1), (1, 1), (0, 0)), mode="reflect")
    xf = xp.reshape(n, p, c)
    xf = jnp.pad(xf, ((0, 0), (g, rin - g - p), (0, 0))).reshape(n * rin, c)

    kernel = functools.partial(_resblock_kernel, wp=wp_, g=g, rout=rout)
    flops = 2 * n * rout * c * c * 10
    bytes_accessed = int(xf.size * 4 + (w3_tap.size + w1_mat.size) * 2
                         + (b3.size + b1.size) * 4 + n * rout * c * 4)

    y = pl.pallas_call(
        kernel,
        out_shape=jax.ShapeDtypeStruct((n * rout, c), jnp.float32),
        grid=(n,),
        in_specs=[
            pl.BlockSpec((rin, c), lambda i: (i, 0)),
            pl.BlockSpec((9, c, c), lambda i: (0, 0, 0)),
            pl.BlockSpec((1, c), lambda i: (0, 0)),
            pl.BlockSpec((c, c), lambda i: (0, 0)),
            pl.BlockSpec((1, c), lambda i: (0, 0)),
        ],
        out_specs=pl.BlockSpec((rout, c), lambda i: (i, 0)),
        scratch_shapes=[pltpu.VMEM((rin, c), jnp.float32)],
        compiler_params=_cparams(),
        cost_estimate=pl.CostEstimate(flops=flops, transcendentals=0,
                                      bytes_accessed=bytes_accessed),
    )(xf, w3_tap, b3, w1_mat, b1)

    y = y.reshape(n, rout, c)[:, :p].reshape(n, hp_, wp_, c)
    return y[:, 1:-1, 1:-1, :]                       # (N, H, W, C)


# ---------------------------------------------------------------------------
# Weight / bias relayout (PyTorch OIHW -> tap-stacked, channel-padded, bf16)
# ---------------------------------------------------------------------------
def _prep_stride2_weight(w_oihw, cout_p, cin_p=None):
    o, i, kh, kw = w_oihw.shape
    assert kh == 4 and kw == 4
    if cin_p is None:
        cin_p = i
    wq = jnp.pad(w_oihw, ((0, cout_p - o), (0, cin_p - i), (0, 0), (0, 0)))
    wq = wq.reshape(cout_p, cin_p, 2, 2, 2, 2)       # (O, c, qi, pi, qj, pj)
    wq = wq.transpose(2, 4, 3, 5, 1, 0)              # (qi, qj, pi, pj, c, O)
    return wq.reshape(4, 4 * cin_p, cout_p).astype(jnp.bfloat16)


def _prep_3x3_weight(w_oihw, cp):
    o, i, _, _ = w_oihw.shape
    wq = jnp.pad(w_oihw, ((0, cp - o), (0, cp - i), (0, 0), (0, 0)))
    return wq.transpose(2, 3, 1, 0).reshape(9, cp, cp).astype(jnp.bfloat16)


def _prep_1x1_weight(w_oihw, cp):
    o, i, _, _ = w_oihw.shape
    wq = jnp.pad(w_oihw[:, :, 0, 0], ((0, cp - o), (0, cp - i)))
    return wq.T.astype(jnp.bfloat16)                 # (I, O)


def _prep_bias(b, cp):
    return jnp.pad(b, (0, cp - b.shape[0])).reshape(1, cp).astype(jnp.float32)


# ---------------------------------------------------------------------------
# Encoder parameters + forward
# ---------------------------------------------------------------------------
def init_encoder_params(channel_size, hidden_dim, key):
    ks = jax.random.split(key, 12)

    def conv_param(kw_key, kb_key, out_ch, in_ch, k):
        fan_in = in_ch * k * k
        bound = 1.0 / jnp.sqrt(fan_in)
        w = jax.random.uniform(kw_key, (out_ch, in_ch, k, k),
                               jnp.float32, -bound, bound)
        b = jax.random.uniform(kb_key, (out_ch,), jnp.float32, -bound, bound)
        return w, b

    p = {}
    p["w1"], p["b1"] = conv_param(ks[0], ks[1], hidden_dim, channel_size, 4)
    p["w2"], p["b2"] = conv_param(ks[2], ks[3], hidden_dim, hidden_dim, 4)
    p["r1w3"], p["r1b3"] = conv_param(ks[4], ks[5], hidden_dim, hidden_dim, 3)
    p["r1w1"], p["r1b1"] = conv_param(ks[6], ks[7], hidden_dim, hidden_dim, 1)
    p["r2w3"], p["r2b3"] = conv_param(ks[8], ks[9], hidden_dim, hidden_dim, 3)
    p["r2w1"], p["r2b1"] = conv_param(ks[10], ks[11], hidden_dim, hidden_dim, 1)
    return p


def encoder_forward(params, x_nchw):
    hidden = params["b1"].shape[0]
    cp = _ceil_to(hidden, LANES)                     # lane-dense channel count
    x = jnp.transpose(x_nchw, (0, 2, 3, 1)).astype(jnp.float32)  # NHWC
    n, h, w, _ = x.shape
    assert h % 4 == 0 and w % 4 == 0, "spatial dims must be multiples of 4"
    # TODO(synk): support odd spatial sizes (needs asymmetric space-to-depth).

    w1t = _prep_stride2_weight(params["w1"], cp)
    w2t = _prep_stride2_weight(params["w2"], cp, cp)
    b1 = _prep_bias(params["b1"], cp)
    b2 = _prep_bias(params["b2"], cp)
    r1w3 = _prep_3x3_weight(params["r1w3"], cp)
    r1w1 = _prep_1x1_weight(params["r1w1"], cp)
    r1b3 = _prep_bias(params["r1b3"], cp)
    r1b1 = _prep_bias(params["r1b1"], cp)
    r2w3 = _prep_3x3_weight(params["r2w3"], cp)
    r2w1 = _prep_1x1_weight(params["r2w1"], cp)
    r2b3 = _prep_bias(params["r2b3"], cp)
    r2b1 = _prep_bias(params["r2b1"], cp)

    # conv_block: Conv4x4/s2 (reflect) -> ReLU (fused into kernel) -> Conv4x4/s2
    h1 = _downsample_conv(x, w1t, b1, relu_out=True)
    h2 = _downsample_conv(h1, w2t, b2, relu_out=False)

    # residual blocks: each one fused pallas_call
    r1 = _residual_block(h2, r1w3, r1b3, r1w1, r1b1)
    out = _residual_block(r1, r2w3, r2b3, r2w1, r2b1)

    out = out[..., :hidden]
    return jnp.transpose(out, (0, 3, 1, 2))          # back to NCHW


# ---------------------------------------------------------------------------
# Pure-JAX reference (sanity check of the Pallas path)
# ---------------------------------------------------------------------------
def _ref_conv(x_nchw, w, b, stride, pad):
    if pad > 0:
        x_nchw = jnp.pad(x_nchw, ((0, 0), (0, 0), (pad, pad), (pad, pad)),
                         mode="reflect")
    y = lax.conv_general_dilated(
        x_nchw, w, window_strides=(stride, stride), padding="VALID",
        dimension_numbers=("NCHW", "OIHW", "NCHW"))
    return y + b[None, :, None, None]


def encoder_forward_ref(p, x):
    h = jnp.maximum(_ref_conv(x, p["w1"], p["b1"], 2, 1), 0.0)
    h = _ref_conv(h, p["w2"], p["b2"], 2, 1)
    t = _ref_conv(jnp.maximum(h, 0.0), p["r1w3"], p["r1b3"], 1, 1)
    r1 = _ref_conv(jnp.maximum(t, 0.0), p["r1w1"], p["r1b1"], 1, 0) + h
    t2 = _ref_conv(jnp.maximum(r1, 0.0), p["r2w3"], p["r2b3"], 1, 1)
    return _ref_conv(jnp.maximum(t2, 0.0), p["r2w1"], p["r2b1"], 1, 0) + r1


if __name__ == "__main__":
    channel_size, hidden_dim = 4, 32
    batch, spatial = 2, 16

    key = jax.random.PRNGKey(0)
    kx, kp = jax.random.split(key)
    x = jax.random.normal(kx, (batch, channel_size, spatial, spatial),
                          jnp.float32)
    params = init_encoder_params(channel_size, hidden_dim, kp)

    fwd = jax.jit(encoder_forward)
    out = jax.block_until_ready(fwd(params, x))
    assert out.shape == (batch, hidden_dim, spatial // 4, spatial // 4), out.shape

    ref = jax.block_until_ready(jax.jit(encoder_forward_ref)(params, x))
    max_err = float(jnp.max(jnp.abs(out - ref)))
    assert jnp.allclose(out, ref, atol=2e-2, rtol=2e-2), max_err

    print("KERNEL_OK")
</pallas_src>

<mosaic_0001>
module attributes {stable_mosaic.version = 11 : i64} {
  func.func @_downsample_kernel(%arg0: i32, %arg1: memref<104x16xf32, #tpu.memory_space<vmem>>, %arg2: memref<4x16x128xbf16, #tpu.memory_space<vmem>>, %arg3: memref<1x128xf32, #tpu.memory_space<vmem>>, %arg4: memref<88x128xf32, #tpu.memory_space<vmem>>) attributes {dimension_semantics = [#tpu.dimension_semantics<parallel>], iteration_bounds = array<i64: 2>, scalar_prefetch = 0 : i64, scratch_operands = 0 : i64, tpu.core_type = #tpu.core_type<tc>, window_params = [{transform_indices = @transform_0, window_bounds = array<i64: 104, 16>}, {pipeline_mode = #tpu.pipeline_mode<synchronous>, transform_indices = @transform_1, window_bounds = array<i64: 4, 16, 128>}, {pipeline_mode = #tpu.pipeline_mode<synchronous>, transform_indices = @transform_2, window_bounds = array<i64: 1, 128>}, {transform_indices = @transform_3, window_bounds = array<i64: 88, 128>}]} {
    %cst = arith.constant 0.000000e+00 : f32
    %0 = vector.broadcast %cst : f32 to vector<88x128xf32>
    %c0 = arith.constant 0 : index
    %c0_0 = arith.constant 0 : index
    %1 = vector.load %arg1[%c0, %c0_0] : memref<104x16xf32, #tpu.memory_space<vmem>>, vector<88x16xf32>
    %2 = arith.truncf %1 : vector<88x16xf32> to vector<88x16xbf16>
    %c0_1 = arith.constant 0 : index
    %c0_2 = arith.constant 0 : index
    %c0_3 = arith.constant 0 : index
    %3 = vector.load %arg2[%c0_1, %c0_2, %c0_3] : memref<4x16x128xbf16, #tpu.memory_space<vmem>>, vector<1x16x128xbf16>
    %4 = vector.shape_cast %3 : vector<1x16x128xbf16> to vector<16x128xbf16>
    %cst_4 = arith.constant dense<0.000000e+00> : vector<88x128xf32>
    %5 = tpu.matmul %2, %4, %cst_4 {dimension_numbers = #tpu.dot_dimension_numbers<[1], [0], [0], [1], [0, 0, 1, 1], [], []>} : vector<88x16xbf16>, vector<16x128xbf16>, vector<88x128xf32> -> vector<88x128xf32>
    %6 = arith.addf %0, %5 : vector<88x128xf32>
    %c1 = arith.constant 1 : index
    %c0_5 = arith.constant 0 : index
    %7 = vector.load %arg1[%c1, %c0_5] : memref<104x16xf32, #tpu.memory_space<vmem>>, vector<88x16xf32>
    %8 = arith.truncf %7 : vector<88x16xf32> to vector<88x16xbf16>
    %c1_6 = arith.constant 1 : index
    %c0_7 = arith.constant 0 : index
    %c0_8 = arith.constant 0 : index
    %9 = vector.load %arg2[%c1_6, %c0_7, %c0_8] : memref<4x16x128xbf16, #tpu.memory_space<vmem>>, vector<1x16x128xbf16>
    %10 = vector.shape_cast %9 : vector<1x16x128xbf16> to vector<16x128xbf16>
    %cst_9 = arith.constant dense<0.000000e+00> : vector<88x128xf32>
    %11 = tpu.matmul %8, %10, %cst_9 {dimension_numbers = #tpu.dot_dimension_numbers<[1], [0], [0], [1], [0, 0, 1, 1], [], []>} : vector<88x16xbf16>, vector<16x128xbf16>, vector<88x128xf32> -> vector<88x128xf32>
    %12 = arith.addf %6, %11 : vector<88x128xf32>
    %c9 = arith.constant 9 : index
    %c0_10 = arith.constant 0 : index
    %13 = vector.load %arg1[%c9, %c0_10] : memref<104x16xf32, #tpu.memory_space<vmem>>, vector<88x16xf32>
    %14 = arith.truncf %13 : vector<88x16xf32> to vector<88x16xbf16>
    %c2 = arith.constant 2 : index
    %c0_11 = arith.constant 0 : index
    %c0_12 = arith.constant 0 : index
    %15 = vector.load %arg2[%c2, %c0_11, %c0_12] : memref<4x16x128xbf16, #tpu.memory_space<vmem>>, vector<1x16x128xbf16>
    %16 = vector.shape_cast %15 : vector<1x16x128xbf16> to vector<16x128xbf16>
    %cst_13 = arith.constant dense<0.000000e+00> : vector<88x128xf32>
    %17 = tpu.matmul %14, %16, %cst_13 {dimension_numbers = #tpu.dot_dimension_numbers<[1], [0], [0], [1], [0, 0, 1, 1], [], []>} : vector<88x16xbf16>, vector<16x128xbf16>, vector<88x128xf32> -> vector<88x128xf32>
    %18 = arith.addf %12, %17 : vector<88x128xf32>
    %c10 = arith.constant 10 : index
    %c0_14 = arith.constant 0 : index
    %19 = vector.load %arg1[%c10, %c0_14] : memref<104x16xf32, #tpu.memory_space<vmem>>, vector<88x16xf32>
    %20 = arith.truncf %19 : vector<88x16xf32> to vector<88x16xbf16>
    %c3 = arith.constant 3 : index
    %c0_15 = arith.constant 0 : index
    %c0_16 = arith.constant 0 : index
    %21 = vector.load %arg2[%c3, %c0_15, %c0_16] : memref<4x16x128xbf16, #tpu.memory_space<vmem>>, vector<1x16x128xbf16>
    %22 = vector.shape_cast %21 : vector<1x16x128xbf16> to vector<16x128xbf16>
    %cst_17 = arith.constant dense<0.000000e+00> : vector<88x128xf32>
    %23 = tpu.matmul %20, %22, %cst_17 {dimension_numbers = #tpu.dot_dimension_numbers<[1], [0], [0], [1], [0, 0, 1, 1], [], []>} : vector<88x16xbf16>, vector<16x128xbf16>, vector<88x128xf32> -> vector<88x128xf32>
    %24 = arith.addf %18, %23 : vector<88x128xf32>
    %c0_18 = arith.constant 0 : index
    %c0_19 = arith.constant 0 : index
    %25 = vector.load %arg3[%c0_18, %c0_19] : memref<1x128xf32, #tpu.memory_space<vmem>>, vector<1x128xf32>
    %26 = vector.broadcast %25 : vector<1x128xf32> to vector<88x128xf32>
    %27 = arith.addf %24, %26 : vector<88x128xf32>
    %cst_20 = arith.constant 0.000000e+00 : f32
    %28 = vector.broadcast %cst_20 : f32 to vector<88x128xf32>
    %29 = arith.maximumf %27, %28 : vector<88x128xf32>
    %c0_21 = arith.constant 0 : index
    %c0_22 = arith.constant 0 : index
    %30 = vector.load %arg4[%c0_21, %c0_22] : memref<88x128xf32, #tpu.memory_space<vmem>>, vector<88x128xf32>
    tpu.vector_store %arg4[%c0_21, %c0_22], %29 {strides = array<i32>} : memref<88x128xf32, #tpu.memory_space<vmem>>, vector<88x128xf32>,
    return
  }
  func.func @transform_0(%arg0: i32) -> (i32, i32) {
    %c0_i32 = arith.constant 0 : i32
    %c0_i32_0 = arith.constant 0 : i32
    return %arg0, %c0_i32 : i32, i32
  }
  func.func @transform_1(%arg0: i32) -> (i32, i32, i32) {
    %c0_i32 = arith.constant 0 : i32
    %c0_i32_0 = arith.constant 0 : i32
    %c0_i32_1 = arith.constant 0 : i32
    %c0_i32_2 = arith.constant 0 : i32
    return %c0_i32, %c0_i32_0, %c0_i32_1 : i32, i32, i32
  }
  func.func @transform_2(%arg0: i32) -> (i32, i32) {
    %c0_i32 = arith.constant 0 : i32
    %c0_i32_0 = arith.constant 0 : i32
    %c0_i32_1 = arith.constant 0 : i32
    return %c0_i32, %c0_i32_0 : i32, i32
  }
  func.func @transform_3(%arg0: i32) -> (i32, i32) {
    %c0_i32 = arith.constant 0 : i32
    %c0_i32_0 = arith.constant 0 : i32
    return %arg0, %c0_i32 : i32, i32
  }
}

module attributes {stable_mosaic.version = 11 : i64} {
  func.func @_downsample_kernel(%arg0: i32, %arg1: memref<40x512xf32, #tpu.memory_space<vmem>>, %arg2: memref<4x512x128xbf16, #tpu.memory_space<vmem>>, %arg3: memref<1x128xf32, #tpu.memory_space<vmem>>, %arg4: memref<32x128xf32, #tpu.memory_space<vmem>>) attributes {dimension_semantics = [#tpu.dimension_semantics<parallel>], iteration_bounds = array<i64: 2>, scalar_prefetch = 0 : i64, scratch_operands = 0 : i64, tpu.core_type = #tpu.core_type<tc>, window_params = [{transform_indices = @transform_0, window_bounds = array<i64: 40, 512>}, {pipeline_mode = #tpu.pipeline_mode<synchronous>, transform_indices = @transform_1, window_bounds = array<i64: 4, 512, 128>}, {pipeline_mode = #tpu.pipeline_mode<synchronous>, transform_indices = @transform_2, window_bounds = array<i64: 1, 128>}, {transform_indices = @transform_3, window_bounds = array<i64: 32, 128>}]} {
    %cst = arith.constant 0.000000e+00 : f32
    %0 = vector.broadcast %cst : f32 to vector<32x128xf32>
    %c0 = arith.constant 0 : index
    %c0_0 = arith.constant 0 : index
    %1 = vector.load %arg1[%c0, %c0_0] : memref<40x512xf32, #tpu.memory_space<vmem>>, vector<32x512xf32>
    %2 = arith.truncf %1 : vector<32x512xf32> to vector<32x512xbf16>
    %c0_1 = arith.constant 0 : index
    %c0_2 = arith.constant 0 : index
    %c0_3 = arith.constant 0 : index
    %3 = vector.load %arg2[%c0_1, %c0_2, %c0_3] : memref<4x512x128xbf16, #tpu.memory_space<vmem>>, vector<1x512x128xbf16>
    %4 = vector.shape_cast %3 : vector<1x512x128xbf16> to vector<512x128xbf16>
    %cst_4 = arith.constant dense<0.000000e+00> : vector<32x128xf32>
    %5 = tpu.matmul %2, %4, %cst_4 {dimension_numbers = #tpu.dot_dimension_numbers<[1], [0], [0], [1], [0, 0, 1, 1], [], []>} : vector<32x512xbf16>, vector<512x128xbf16>, vector<32x128xf32> -> vector<32x128xf32>
    %6 = arith.addf %0, %5 : vector<32x128xf32>
    %c1 = arith.constant 1 : index
    %c0_5 = arith.constant 0 : index
    %7 = vector.load %arg1[%c1, %c0_5] : memref<40x512xf32, #tpu.memory_space<vmem>>, vector<32x512xf32>
    %8 = arith.truncf %7 : vector<32x512xf32> to vector<32x512xbf16>
    %c1_6 = arith.constant 1 : index
    %c0_7 = arith.constant 0 : index
    %c0_8 = arith.constant 0 : index
    %9 = vector.load %arg2[%c1_6, %c0_7, %c0_8] : memref<4x512x128xbf16, #tpu.memory_space<vmem>>, vector<1x512x128xbf16>
    %10 = vector.shape_cast %9 : vector<1x512x128xbf16> to vector<512x128xbf16>
    %cst_9 = arith.constant dense<0.000000e+00> : vector<32x128xf32>
    %11 = tpu.matmul %8, %10, %cst_9 {dimension_numbers = #tpu.dot_dimension_numbers<[1], [0], [0], [1], [0, 0, 1, 1], [], []>} : vector<32x512xbf16>, vector<512x128xbf16>, vector<32x128xf32> -> vector<32x128xf32>
    %12 = arith.addf %6, %11 : vector<32x128xf32>
    %c5 = arith.constant 5 : index
    %c0_10 = arith.constant 0 : index
    %13 = vector.load %arg1[%c5, %c0_10] : memref<40x512xf32, #tpu.memory_space<vmem>>, vector<32x512xf32>
    %14 = arith.truncf %13 : vector<32x512xf32> to vector<32x512xbf16>
    %c2 = arith.constant 2 : index
    %c0_11 = arith.constant 0 : index
    %c0_12 = arith.constant 0 : index
    %15 = vector.load %arg2[%c2, %c0_11, %c0_12] : memref<4x512x128xbf16, #tpu.memory_space<vmem>>, vector<1x512x128xbf16>
    %16 = vector.shape_cast %15 : vector<1x512x128xbf16> to vector<512x128xbf16>
    %cst_13 = arith.constant dense<0.000000e+00> : vector<32x128xf32>
    %17 = tpu.matmul %14, %16, %cst_13 {dimension_numbers = #tpu.dot_dimension_numbers<[1], [0], [0], [1], [0, 0, 1, 1], [], []>} : vector<32x512xbf16>, vector<512x128xbf16>, vector<32x128xf32> -> vector<32x128xf32>
    %18 = arith.addf %12, %17 : vector<32x128xf32>
    %c6 = arith.constant 6 : index
    %c0_14 = arith.constant 0 : index
    %19 = vector.load %arg1[%c6, %c0_14] : memref<40x512xf32, #tpu.memory_space<vmem>>, vector<32x512xf32>
    %20 = arith.truncf %19 : vector<32x512xf32> to vector<32x512xbf16>
    %c3 = arith.constant 3 : index
    %c0_15 = arith.constant 0 : index
    %c0_16 = arith.constant 0 : index
    %21 = vector.load %arg2[%c3, %c0_15, %c0_16] : memref<4x512x128xbf16, #tpu.memory_space<vmem>>, vector<1x512x128xbf16>
    %22 = vector.shape_cast %21 : vector<1x512x128xbf16> to vector<512x128xbf16>
    %cst_17 = arith.constant dense<0.000000e+00> : vector<32x128xf32>
    %23 = tpu.matmul %20, %22, %cst_17 {dimension_numbers = #tpu.dot_dimension_numbers<[1], [0], [0], [1], [0, 0, 1, 1], [], []>} : vector<32x512xbf16>, vector<512x128xbf16>, vector<32x128xf32> -> vector<32x128xf32>
    %24 = arith.addf %18, %23 : vector<32x128xf32>
    %c0_18 = arith.constant 0 : index
    %c0_19 = arith.constant 0 : index
    %25 = vector.load %arg3[%c0_18, %c0_19] : memref<1x128xf32, #tpu.memory_space<vmem>>, vector<1x128xf32>
    %26 = vector.broadcast %25 : vector<1x128xf32> to vector<32x128xf32>
    %27 = arith.addf %24, %26 : vector<32x128xf32>
    %c0_20 = arith.constant 0 : index
    %c0_21 = arith.constant 0 : index
    %28 = vector.load %arg4[%c0_20, %c0_21] : memref<32x128xf32, #tpu.memory_space<vmem>>, vector<32x128xf32>
    tpu.vector_store %arg4[%c0_20, %c0_21], %27 {strides = array<i32>} : memref<32x128xf32, #tpu.memory_space<vmem>>, vector<32x128xf32>,
    return
  }
  func.func @transform_0(%arg0: i32) -> (i32, i32) {
    %c0_i32 = arith.constant 0 : i32
    %c0_i32_0 = arith.constant 0 : i32
    return %arg0, %c0_i32 : i32, i32
  }
  func.func @transform_1(%arg0: i32) -> (i32, i32, i32) {
    %c0_i32 = arith.constant 0 : i32
    %c0_i32_0 = arith.constant 0 : i32
    %c0_i32_1 = arith.constant 0 : i32
    %c0_i32_2 = arith.constant 0 : i32
    return %c0_i32, %c0_i32_0, %c0_i32_1 : i32, i32, i32
  }
  func.func @transform_2(%arg0: i32) -> (i32, i32) {
    %c0_i32 = arith.constant 0 : i32
    %c0_i32_0 = arith.constant 0 : i32
    %c0_i32_1 = arith.constant 0 : i32
    return %c0_i32, %c0_i32_0 : i32, i32
  }
  func.func @transform_3(%arg0: i32) -> (i32, i32) {
    %c0_i32 = arith.constant 0 : i32
    %c0_i32_0 = arith.constant 0 : i32
    return %arg0, %c0_i32 : i32, i32
  }
}

module attributes {stable_mosaic.version = 11 : i64} {
  func.func @_resblock_kernel(%arg0: i32, %arg1: memref<56x128xf32, #tpu.memory_space<vmem>>, %arg2: memref<9x128x128xbf16, #tpu.memory_space<vmem>>, %arg3: memref<1x128xf32, #tpu.memory_space<vmem>>, %arg4: memref<128x128xbf16, #tpu.memory_space<vmem>>, %arg5: memref<1x128xf32, #tpu.memory_space<vmem>>, %arg6: memref<40x128xf32, #tpu.memory_space<vmem>>, %arg7: memref<56x128xf32, #tpu.memory_space<vmem>>) attributes {dimension_semantics = [#tpu.dimension_semantics<parallel>], iteration_bounds = array<i64: 2>, scalar_prefetch = 0 : i64, scratch_operands = 1 : i64, tpu.core_type = #tpu.core_type<tc>, window_params = [{transform_indices = @transform_0, window_bounds = array<i64: 56, 128>}, {pipeline_mode = #tpu.pipeline_mode<synchronous>, transform_indices = @transform_1, window_bounds = array<i64: 9, 128, 128>}, {pipeline_mode = #tpu.pipeline_mode<synchronous>, transform_indices = @transform_2, window_bounds = array<i64: 1, 128>}, {pipeline_mode = #tpu.pipeline_mode<synchronous>, transform_indices = @transform_3, window_bounds = array<i64: 128, 128>}, {pipeline_mode = #tpu.pipeline_mode<synchronous>, transform_indices = @transform_4, window_bounds = array<i64: 1, 128>}, {transform_indices = @transform_5, window_bounds = array<i64: 40, 128>}]} {
    %c0 = arith.constant 0 : index
    %c0_0 = arith.constant 0 : index
    %0 = vector.load %arg1[%c0, %c0_0] : memref<56x128xf32, #tpu.memory_space<vmem>>, vector<56x128xf32>
    %cst = arith.constant 0.000000e+00 : f32
    %1 = vector.broadcast %cst : f32 to vector<56x128xf32>
    %2 = arith.maximumf %0, %1 : vector<56x128xf32>
    %c0_1 = arith.constant 0 : index
    %c0_2 = arith.constant 0 : index
    %3 = vector.load %arg7[%c0_1, %c0_2] : memref<56x128xf32, #tpu.memory_space<vmem>>, vector<56x128xf32>
    tpu.vector_store %arg7[%c0_1, %c0_2], %2 {strides = array<i32>} : memref<56x128xf32, #tpu.memory_space<vmem>>, vector<56x128xf32>,
    %cst_3 = arith.constant 0.000000e+00 : f32
    %4 = vector.broadcast %cst_3 : f32 to vector<40x128xf32>
    %c1 = arith.constant 1 : index
    %c0_4 = arith.constant 0 : index
    %5 = vector.load %arg7[%c1, %c0_4] : memref<56x128xf32, #tpu.memory_space<vmem>>, vector<40x128xf32>
    %6 = arith.truncf %5 : vector<40x128xf32> to vector<40x128xbf16>
    %c0_5 = arith.constant 0 : index
    %c0_6 = arith.constant 0 : index
    %c0_7 = arith.constant 0 : index
    %7 = vector.load %arg2[%c0_5, %c0_6, %c0_7] : memref<9x128x128xbf16, #tpu.memory_space<vmem>>, vector<1x128x128xbf16>
    %8 = vector.shape_cast %7 : vector<1x128x128xbf16> to vector<128x128xbf16>
    %cst_8 = arith.constant dense<0.000000e+00> : vector<40x128xf32>
    %9 = tpu.matmul %6, %8, %cst_8 {dimension_numbers = #tpu.dot_dimension_numbers<[1], [0], [0], [1], [0, 0, 1, 1], [], []>} : vector<40x128xbf16>, vector<128x128xbf16>, vector<40x128xf32> -> vector<40x128xf32>
    %10 = arith.addf %4, %9 : vector<40x128xf32>
    %c2 = arith.constant 2 : index
    %c0_9 = arith.constant 0 : index
    %11 = vector.load %arg7[%c2, %c0_9] : memref<56x128xf32, #tpu.memory_space<vmem>>, vector<40x128xf32>
    %12 = arith.truncf %11 : vector<40x128xf32> to vector<40x128xbf16>
    %c1_10 = arith.constant 1 : index
    %c0_11 = arith.constant 0 : index
    %c0_12 = arith.constant 0 : index
    %13 = vector.load %arg2[%c1_10, %c0_11, %c0_12] : memref<9x128x128xbf16, #tpu.memory_space<vmem>>, vector<1x128x128xbf16>
    %14 = vector.shape_cast %13 : vector<1x128x128xbf16> to vector<128x128xbf16>
    %cst_13 = arith.constant dense<0.000000e+00> : vector<40x128xf32>
    %15 = tpu.matmul %12, %14, %cst_13 {dimension_numbers = #tpu.dot_dimension_numbers<[1], [0], [0], [1], [0, 0, 1, 1], [], []>} : vector<40x128xbf16>, vector<128x128xbf16>, vector<40x128xf32> -> vector<40x128xf32>
    %16 = arith.addf %10, %15 : vector<40x128xf32>
    %c3 = arith.constant 3 : index
    %c0_14 = arith.constant 0 : index
    %17 = vector.load %arg7[%c3, %c0_14] : memref<56x128xf32, #tpu.memory_space<vmem>>, vector<40x128xf32>
    %18 = arith.truncf %17 : vector<40x128xf32> to vector<40x128xbf16>
    %c2_15 = arith.constant 2 : index
    %c0_16 = arith.constant 0 : index
    %c0_17 = arith.constant 0 : index
    %19 = vector.load %arg2[%c2_15, %c0_16, %c0_17] : memref<9x128x128xbf16, #tpu.memory_space<vmem>>, vector<1x128x128xbf16>
    %20 = vector.shape_cast %19 : vector<1x128x128xbf16> to vector<128x128xbf16>
    %cst_18 = arith.constant dense<0.000000e+00> : vector<40x128xf32>
    %21 = tpu.matmul %18, %20, %cst_18 {dimension_numbers = #tpu.dot_dimension_numbers<[1], [0], [0], [1], [0, 0, 1, 1], [], []>} : vector<40x128xbf16>, vector<128x128xbf16>, vector<40x128xf32> -> vector<40x128xf32>
    %22 = arith.addf %16, %21 : vector<40x128xf32>
    %c7 = arith.constant 7 : index
    %c0_19 = arith.constant 0 : index
    %23 = vector.load %arg7[%c7, %c0_19] : memref<56x128xf32, #tpu.memory_space<vmem>>, vector<40x128xf32>
    %24 = arith.truncf %23 : vector<40x128xf32> to vector<40x128xbf16>
    %c3_20 = arith.constant 3 : index
    %c0_21 = arith.constant 0 : index
    %c0_22 = arith.constant 0 : index
    %25 = vector.load %arg2[%c3_20, %c0_21, %c0_22] : memref<9x128x128xbf16, #tpu.memory_space<vmem>>, vector<1x128x128xbf16>
    %26 = vector.shape_cast %25 : vector<1x128x128xbf16> to vector<128x128xbf16>
    %cst_23 = arith.constant dense<0.000000e+00> : vector<40x128xf32>
    %27 = tpu.matmul %24, %26, %cst_23 {dimension_numbers = #tpu.dot_dimension_numbers<[1], [0], [0], [1], [0, 0, 1, 1], [], []>} : vector<40x128xbf16>, vector<128x128xbf16>, vector<40x128xf32> -> vector<40x128xf32>
    %28 = arith.addf %22, %27 : vector<40x128xf32>
    %c8 = arith.constant 8 : index
    %c0_24 = arith.constant 0 : index
    %29 = vector.load %arg7[%c8, %c0_24] : memref<56x128xf32, #tpu.memory_space<vmem>>, vector<40x128xf32>
    %30 = arith.truncf %29 : vector<40x128xf32> to vector<40x128xbf16>
    %c4 = arith.constant 4 : index
    %c0_25 = arith.constant 0 : index
    %c0_26 = arith.constant 0 : index
    %31 = vector.load %arg2[%c4, %c0_25, %c0_26] : memref<9x128x128xbf16, #tpu.memory_space<vmem>>, vector<1x128x128xbf16>
    %32 = vector.shape_cast %31 : vector<1x128x128xbf16> to vector<128x128xbf16>
    %cst_27 = arith.constant dense<0.000000e+00> : vector<40x128xf32>
    %33 = tpu.matmul %30, %32, %cst_27 {dimension_numbers = #tpu.dot_dimension_numbers<[1], [0], [0], [1], [0, 0, 1, 1], [], []>} : vector<40x128xbf16>, vector<128x128xbf16>, vector<40x128xf32> -> vector<40x128xf32>
    %34 = arith.addf %28, %33 : vector<40x128xf32>
    %c9 = arith.constant 9 : index
    %c0_28 = arith.constant 0 : index
    %35 = vector.load %arg7[%c9, %c0_28] : memref<56x128xf32, #tpu.memory_space<vmem>>, vector<40x128xf32>
    %36 = arith.truncf %35 : vector<40x128xf32> to vector<40x128xbf16>
    %c5 = arith.constant 5 : index
    %c0_29 = arith.constant 0 : index
    %c0_30 = arith.constant 0 : index
    %37 = vector.load %arg2[%c5, %c0_29, %c0_30] : memref<9x128x128xbf16, #tpu.memory_space<vmem>>, vector<1x128x128xbf16>
    %38 = vector.shape_cast %37 : vector<1x128x128xbf16> to vector<128x128xbf16>
    %cst_31 = arith.constant dense<0.000000e+00> : vector<40x128xf32>
    %39 = tpu.matmul %36, %38, %cst_31 {dimension_numbers = #tpu.dot_dimension_numbers<[1], [0], [0], [1], [0, 0, 1, 1], [], []>} : vector<40x128xbf16>, vector<128x128xbf16>, vector<40x128xf32> -> vector<40x128xf32>
    %40 = arith.addf %34, %39 : vector<40x128xf32>
    %c13 = arith.constant 13 : index
    %c0_32 = arith.constant 0 : index
    %41 = vector.load %arg7[%c13, %c0_32] : memref<56x128xf32, #tpu.memory_space<vmem>>, vector<40x128xf32>
    %42 = arith.truncf %41 : vector<40x128xf32> to vector<40x128xbf16>
    %c6 = arith.constant 6 : index
    %c0_33 = arith.constant 0 : index
    %c0_34 = arith.constant 0 : index
    %43 = vector.load %arg2[%c6, %c0_33, %c0_34] : memref<9x128x128xbf16, #tpu.memory_space<vmem>>, vector<1x128x128xbf16>
    %44 = vector.shape_cast %43 : vector<1x128x128xbf16> to vector<128x128xbf16>
    %cst_35 = arith.constant dense<0.000000e+00> : vector<40x128xf32>
    %45 = tpu.matmul %42, %44, %cst_35 {dimension_numbers = #tpu.dot_dimension_numbers<[1], [0], [0], [1], [0, 0, 1, 1], [], []>} : vector<40x128xbf16>, vector<128x128xbf16>, vector<40x128xf32> -> vector<40x128xf32>
    %46 = arith.addf %40, %45 : vector<40x128xf32>
    %c14 = arith.constant 14 : index
    %c0_36 = arith.constant 0 : index
    %47 = vector.load %arg7[%c14, %c0_36] : memref<56x128xf32, #tpu.memory_space<vmem>>, vector<40x128xf32>
    %48 = arith.truncf %47 : vector<40x128xf32> to vector<40x128xbf16>
    %c7_37 = arith.constant 7 : index
    %c0_38 = arith.constant 0 : index
    %c0_39 = arith.constant 0 : index
    %49 = vector.load %arg2[%c7_37, %c0_38, %c0_39] : memref<9x128x128xbf16, #tpu.memory_space<vmem>>, vector<1x128x128xbf16>
    %50 = vector.shape_cast %49 : vector<1x128x128xbf16> to vector<128x128xbf16>
    %cst_40 = arith.constant dense<0.000000e+00> : vector<40x128xf32>
    %51 = tpu.matmul %48, %50, %cst_40 {dimension_numbers = #tpu.dot_dimension_numbers<[1], [0], [0], [1], [0, 0, 1, 1], [], []>} : vector<40x128xbf16>, vector<128x128xbf16>, vector<40x128xf32> -> vector<40x128xf32>
    %52 = arith.addf %46, %51 : vector<40x128xf32>
    %c15 = arith.constant 15 : index
    %c0_41 = arith.constant 0 : index
    %53 = vector.load %arg7[%c15, %c0_41] : memref<56x128xf32, #tpu.memory_space<vmem>>, vector<40x128xf32>
    %54 = arith.truncf %53 : vector<40x128xf32> to vector<40x128xbf16>
    %c8_42 = arith.constant 8 : index
    %c0_43 = arith.constant 0 : index
    %c0_44 = arith.constant 0 : index
    %55 = vector.load %arg2[%c8_42, %c0_43, %c0_44] : memref<9x128x128xbf16, #tpu.memory_space<vmem>>, vector<1x128x128xbf16>
    %56 = vector.shape_cast %55 : vector<1x128x128xbf16> to vector<128x128xbf16>
    %cst_45 = arith.constant dense<0.000000e+00> : vector<40x128xf32>
    %57 = tpu.matmul %54, %56, %cst_45 {dimension_numbers = #tpu.dot_dimension_numbers<[1], [0], [0], [1], [0, 0, 1, 1], [], []>} : vector<40x128xbf16>, vector<128x128xbf16>, vector<40x128xf32> -> vector<40x128xf32>
    %58 = arith.addf %52, %57 : vector<40x128xf32>
    %c0_46 = arith.constant 0 : index
    %c0_47 = arith.constant 0 : index
    %59 = vector.load %arg3[%c0_46, %c0_47] : memref<1x128xf32, #tpu.memory_space<vmem>>, vector<1x128xf32>
    %60 = vector.broadcast %59 : vector<1x128xf32> to vector<40x128xf32>
    %61 = arith.addf %58, %60 : vector<40x128xf32>
    %cst_48 = arith.constant 0.000000e+00 : f32
    %62 = vector.broadcast %cst_48 : f32 to vector<40x128xf32>
    %63 = arith.maximumf %61, %62 : vector<40x128xf32>
    %64 = arith.truncf %63 : vector<40x128xf32> to vector<40x128xbf16>
    %c0_49 = arith.constant 0 : index
    %c0_50 = arith.constant 0 : index
    %65 = vector.load %arg4[%c0_49, %c0_50] : memref<128x128xbf16, #tpu.memory_space<vmem>>, vector<128x128xbf16>
    %cst_51 = arith.constant dense<0.000000e+00> : vector<40x128xf32>
    %66 = tpu.matmul %64, %65, %cst_51 {dimension_numbers = #tpu.dot_dimension_numbers<[1], [0], [0], [1], [0, 0, 1, 1], [], []>} : vector<40x128xbf16>, vector<128x128xbf16>, vector<40x128xf32> -> vector<40x128xf32>
    %c0_52 = arith.constant 0 : index
    %c0_53 = arith.constant 0 : index
    %67 = vector.load %arg5[%c0_52, %c0_53] : memref<1x128xf32, #tpu.memory_space<vmem>>, vector<1x128xf32>
    %68 = vector.broadcast %67 : vector<1x128xf32> to vector<40x128xf32>
    %69 = arith.addf %66, %68 : vector<40x128xf32>
    %c8_54 = arith.constant 8 : index
    %c0_55 = arith.constant 0 : index
    %70 = vector.load %arg1[%c8_54, %c0_55] : memref<56x128xf32, #tpu.memory_space<vmem>>, vector<40x128xf32>
    %71 = arith.addf %69, %70 : vector<40x128xf32>
    %c0_56 = arith.constant 0 : index
    %c0_57 = arith.constant 0 : index
    %72 = vector.load %arg6[%c0_56, %c0_57] : memref<40x128xf32, #tpu.memory_space<vmem>>, vector<40x128xf32>
    tpu.vector_store %arg6[%c0_56, %c0_57], %71 {strides = array<i32>} : memref<40x128xf32, #tpu.memory_space<vmem>>, vector<40x128xf32>,
    return
  }
  func.func @transform_0(%arg0: i32) -> (i32, i32) {
    %c0_i32 = arith.constant 0 : i32
    %c0_i32_0 = arith.constant 0 : i32
    return %arg0, %c0_i32 : i32, i32
  }
  func.func @transform_1(%arg0: i32) -> (i32, i32, i32) {
    %c0_i32 = arith.constant 0 : i32
    %c0_i32_0 = arith.constant 0 : i32
    %c0_i32_1 = arith.constant 0 : i32
    %c0_i32_2 = arith.constant 0 : i32
    return %c0_i32, %c0_i32_0, %c0_i32_1 : i32, i32, i32
  }
  func.func @transform_2(%arg0: i32) -> (i32, i32) {
    %c0_i32 = arith.constant 0 : i32
    %c0_i32_0 = arith.constant 0 : i32
    %c0_i32_1 = arith.constant 0 : i32
    return %c0_i32, %c0_i32_0 : i32, i32
  }
  func.func @transform_3(%arg0: i32) -> (i32, i32) {
    %c0_i32 = arith.constant 0 : i32
    %c0_i32_0 = arith.constant 0 : i32
    %c0_i32_1 = arith.constant 0 : i32
    return %c0_i32, %c0_i32_0 : i32, i32
  }
  func.func @transform_4(%arg0: i32) -> (i32, i32) {
    %c0_i32 = arith.constant 0 : i32
    %c0_i32_0 = arith.constant 0 : i32
    %c0_i32_1 = arith.constant 0 : i32
    return %c0_i32, %c0_i32_0 : i32, i32
  }
  func.func @transform_5(%arg0: i32) -> (i32, i32) {
    %c0_i32 = arith.constant 0 : i32
    %c0_i32_0 = arith.constant 0 : i32
    return %arg0, %c0_i32 : i32, i32
  }
}

</mosaic_0001>

<bundles_post_ra>
// kernel: encoder_forward.4
= control target key start
LH: loop header
LB: loop body
LE: loop exit
PB: predicated region body
PF: predicated region fallthrough
CT: control target
= control target key end

     0   :  { %s981_s12 = smov 0   ;;  %s1118_s0 = inlined_call_operand.vmem [shape: f32[208,16], index: 0, kind: input, shape index: {}]   ;;  %s1119_s1 = inlined_call_operand.vmem [shape: bf16[4,16,128], index: 1, kind: input, shape index: {}]   ;;  %s1120_s2 = inlined_call_operand.vmem [shape: f32[1,128], index: 2, kind: input, shape index: {}]   ;;  %s1121_s3 = inlined_call_operand.vmem [shape: f32[176,128], index: 3, kind: output, shape index: {}]  }
   0x1 LB: > { %s789_s13 = sadd.s32 4294967295, %s959_s12   ;;  %p793_p0 = scmp.ge.s32.totalorder %s959_s12, 1  ;;  %s959_s12 = sphi %s981_s12, %s13_s12  }
   0x2   : > { %p138_p1 = scmp.lt.s32.totalorder %s959_s12, 3 }
   0x4   : > { %p139_p2 = pnand %p793_p0, %p138_p1 }
   0x5   : > { %v949_v0 = vld [vmem:[%s1119_s1 + $0x8] sm:$0xff] (!%p139_p2)   ;;  %s162_s16 = smul.u32 (!%p139_p2), 13, %s789_s13  ;;  %v950_v1 = vld [vmem:[%s1119_s1 + $0x10] sm:$0xff] (!%p139_p2)   ;;  %v951_v2 = vld [vmem:[%s1119_s1] sm:$0xff] (!%p139_p2)   ;;  %vm220_vm0 = vcmask (!%p139_p2), 130048  }
   0x6   : > { %142 = sbr.rel (%p139_p2) target bundleno = 286 (0x11e), region = 32  ;;  %861 = vmatprep.subr.bf16.mxu1 (!%p139_p2), %v949_v0  ;;  %889 = vmatprep.subr.bf16.mxu0 (!%p139_p2), %v950_v1  ;;  %v952_v3 = vld [vmem:[%s1119_s1 + $0x18] sm:$0xff] (!%p139_p2)  }
   0x7   : > { %p163_p3 = scmp.lt.s32.totalorder (!%p139_p2), %s162_s16, 25  ;;  %862 = vmatpush3.bf16.msra.mxu1 (!%p139_p2), %v949_v0  ;;  %890 = vmatpush3.bf16.msra.mxu0 (!%p139_p2), %v950_v1  ;;  %s168_s27 = smul.u32 (!%p139_p2), 11, %s789_s13 }
   0x8   : > { %875 = vmatprep.subr.bf16.mxu1 (!%p139_p2), %v951_v2  ;;  %903 = vmatprep.subr.bf16.mxu0 (!%p139_p2), %v952_v3 }
   0x9   : > { %p169_p4 = scmp.lt.s32.totalorder (!%p139_p2), %s168_s27, 21 }
   0xd   : > { %s1123_s16 = smov (!%p163_p3, %s162_s16), 25  ;;  %s1125_s27 = smov (!%p169_p4, %s168_s27), 21 }
   0xe   : > { %s794_s23 = sshll.u32 %s1123_s16, 3  ;;  %s795_s30 = sshll.u32 %s1125_s27, 3 }
   0xf   : > { %s1006_s26 = scalar_lea.vmem %s1118_s0, %s794_s23  ;;  %s1087_s6 = scalar_lea.vmem %s1121_s3, %s795_s30 }
  0x10   : > { %v194_v4 = vld [vmem:[%s1006_s26 + $0x1] sm:$0xff]  ;;  %v195_v5 = vld [vmem:[%s1006_s26 + $0x9] sm:$0xff]  ;;  %v424_v6 = vld [vmem:[%s1006_s26 + $0x11] sm:$0xff] }
  0x11   : > { %v205_v7 = vpack.c.bf16 %v195_v5, %v194_v4  ;;  %v434_v8 = vpack.c.bf16 %v424_v6, %v195_v5  ;;  %v197_v9 = vld [vmem:[%s1006_s26 + $0x19] sm:$0xff]  ;;  %v426_v10 = vld [vmem:[%s1006_s26 + $0x21] sm:$0xff]  ;;  %v199_v11 = vld [vmem:[%s1006_s26 + $0x29] sm:$0xff] }
  0x12   : > { %v206_v12 = vpack.c.bf16 %v197_v9, %v424_v6  ;;  %v435_v13 = vpack.c.bf16 %v426_v10, %v197_v9  ;;  %v207_v14 = vpack.c.bf16 %v199_v11, %v426_v10  ;;  %v428_v15 = vld [vmem:[%s1006_s26 + $0x31] sm:$0xff]  ;;  %v201_v17 = vld [vmem:[%s1006_s26 + $0x39] sm:$0xff]  ;;  %v430_v18 = vld [vmem:[%s1006_s26 + $0x41] sm:$0xff] }
  0x13   : > { %863 = vmatprep.mubr.msk.bf16.mxu1 %vm220_vm0, %v205_v7  ;;  %891 = vmatprep.mubr.msk.bf16.mxu0 %vm220_vm0, %v434_v8  ;;  %v436_v16 = vpack.c.bf16 %v428_v15, %v199_v11  ;;  %v203_v19 = vld [vmem:[%s1006_s26 + $0x49] sm:$0xff]  ;;  %v432_v20 = vld [vmem:[%s1006_s26 + $0x51] sm:$0xff]  ;;  %v208_v21 = vpack.c.bf16 %v201_v17, %v428_v15  ;;  %v437_v22 = vpack.c.bf16 %v430_v18, %v201_v17  ;;  %v433_v25 = vld [vmem:[%s1006_s26 + $0x59] sm:$0xff] }
  0x14   : > { %864 = vmatmul.mubr.msk.bf16.vlgmr.msra.gmra.mrb[0].mxu1 %vm220_vm0, %v206_v12  ;;  %892 = vmatmul.mubr.msk.bf16.vlgmr.msra.gmra.mrb[0].mxu0 %vm220_vm0, %v435_v13  ;;  %v209_v23 = vpack.c.bf16 %v203_v19, %v430_v18  ;;  %v438_v24 = vpack.c.bf16 %v432_v20, %v203_v19  ;;  %v175_v26 = vld [vmem:[%s1006_s26] sm:$0xff]  ;;  %v176_v27 = vld [vmem:[%s1006_s26 + $0x8] sm:$0xff]  ;;  %v559_v29 = vld [vmem:[%s1006_s26 + $0x12] sm:$0xff]  ;;  %v210_v30 = vpack.c.bf16 %v432_v20, %v432_v20 }
  0x15   : > { %876 = vmatpush3.bf16.msra.mxu1 %v951_v2  ;;  %904 = vmatpush3.bf16.msra.mxu0 %v952_v3  ;;  %v558_v28 = vld [vmem:[%s1006_s26 + $0xa] sm:$0xff]  ;;  %v439_v31 = vpack.c.bf16 %v433_v25, %v433_v25  ;;  %v186_v32 = vpack.c.bf16 %v176_v27, %v175_v26  ;;  %v178_v35 = vld [vmem:[%s1006_s26 + $0x18] sm:$0xff]  ;;  %v561_v37 = vld [vmem:[%s1006_s26 + $0x22] sm:$0xff] }
  0x16   : > { %867 = vmatprep.mubr.msk.bf16.mxu1 %vm220_vm0, %v207_v14  ;;  %895 = vmatprep.mubr.msk.bf16.mxu0 %vm220_vm0, %v436_v16  ;;  %v569_v33 = vpack.c.bf16 %v559_v29, %v558_v28  ;;  %v177_v34 = vld [vmem:[%s1006_s26 + $0x10] sm:$0xff]  ;;  %v560_v36 = vld [vmem:[%s1006_s26 + $0x1a] sm:$0xff]  ;;  %v180_v39 = vld [vmem:[%s1006_s26 + $0x28] sm:$0xff] }
  0x17   : > { %v179_v38 = vld [vmem:[%s1006_s26 + $0x20] sm:$0xff]  ;;  %v562_v40 = vld [vmem:[%s1006_s26 + $0x2a] sm:$0xff]  ;;  %v563_v41 = vld [vmem:[%s1006_s26 + $0x32] sm:$0xff]  ;;  %v187_v42 = vpack.c.bf16 %v178_v35, %v177_v34  ;;  %v570_v43 = vpack.c.bf16 %v561_v37, %v560_v36 }
  0x18   : > { %v188_v44 = vpack.c.bf16 %v180_v39, %v179_v38  ;;  %v571_v45 = vpack.c.bf16 %v563_v41, %v562_v40  ;;  %v181_v46 = vld [vmem:[%s1006_s26 + $0x30] sm:$0xff]  ;;  %v182_v47 = vld [vmem:[%s1006_s26 + $0x38] sm:$0xff]  ;;  %v565_v49 = vld [vmem:[%s1006_s26 + $0x42] sm:$0xff] }
  0x19   : > { %v564_v48 = vld [vmem:[%s1006_s26 + $0x3a] sm:$0xff]  ;;  %v184_v51 = vld [vmem:[%s1006_s26 + $0x48] sm:$0xff]  ;;  %v567_v53 = vld [vmem:[%s1006_s26 + $0x52] sm:$0xff]  ;;  %v189_v54 = vpack.c.bf16 %v182_v47, %v181_v46 }
  0x1a   : > { %v183_v50 = vld [vmem:[%s1006_s26 + $0x40] sm:$0xff]  ;;  %v566_v52 = vld [vmem:[%s1006_s26 + $0x4a] sm:$0xff]  ;;  %v572_v55 = vpack.c.bf16 %v565_v49, %v564_v48 }
  0x1b   : > { %v190_v56 = vpack.c.bf16 %v184_v51, %v183_v50  ;;  %v573_v57 = vpack.c.bf16 %v567_v53, %v566_v52  ;;  %v185_v58 = vld [vmem:[%s1006_s26 + $0x50] sm:$0xff]  ;;  %v568_v59 = vld [vmem:[%s1006_s26 + $0x5a] sm:$0xff] }
  0x1c   : > { %868 = vmatmul.mubr.msk.bf16.gmra.mrb[4].mxu1 %vm220_vm0, %v208_v21  ;;  %896 = vmatmul.mubr.msk.bf16.gmra.mrb[4].mxu0 %vm220_vm0, %v437_v22  ;;  %v191_v60 = vpack.c.bf16 %v185_v58, %v185_v58  ;;  %v574_v61 = vpack.c.bf16 %v568_v59, %v568_v59  ;;  %v1081_v8 = vld [vmem:[%s1120_s2] ss:$0 sm:$0xff] }
  0x1d   : > { %871 = vmatprep.mubr.msk.bf16.mxu1 %vm220_vm0, %v209_v23  ;;  %899 = vmatprep.mubr.msk.bf16.mxu0 %vm220_vm0, %v438_v24 }
  0x24   : > { %872 = vmatmul.mubr.msk.bf16.gmra.mrb[8].mxu1 %vm220_vm0, %v210_v30  ;;  %900 = vmatmul.mubr.msk.bf16.gmra.mrb[8].mxu0 %vm220_vm0, %v439_v31 }
  0x25   : > { %877 = vmatprep.mubr.msk.bf16.mxu1 %vm220_vm0, %v186_v32  ;;  %905 = vmatprep.mubr.msk.bf16.mxu0 %vm220_vm0, %v569_v33 }
  0x2c   : > { %878 = vmatmul.mubr.msk.bf16.vlgmr.msra.gmra.mrb[0].mxu1 %vm220_vm0, %v187_v42  ;;  %906 = vmatmul.mubr.msk.bf16.vlgmr.msra.gmra.mrb[0].mxu0 %vm220_vm0, %v570_v43 }
  0x2d   : > { %881 = vmatprep.mubr.msk.bf16.mxu1 %vm220_vm0, %v188_v44  ;;  %909 = vmatprep.mubr.msk.bf16.mxu0 %vm220_vm0, %v571_v45 }
  0x34   : > { %882 = vmatmul.mubr.msk.bf16.gmra.mrb[4].mxu1 %vm220_vm0, %v189_v54  ;;  %910 = vmatmul.mubr.msk.bf16.gmra.mrb[4].mxu0 %vm220_vm0, %v572_v55 }
  0x35   : > { %885 = vmatprep.mubr.msk.bf16.mxu1 %vm220_vm0, %v190_v56  ;;  %913 = vmatprep.mubr.msk.bf16.mxu0 %vm220_vm0, %v573_v57 }
  0x3c   : > { %886 = vmatmul.mubr.msk.bf16.gmra.mrb[12].mxu1 %vm220_vm0, %v191_v60  ;;  %914 = vmatmul.mubr.msk.bf16.gmra.mrb[12].mxu0 %vm220_vm0, %v574_v61 }
  0xf7   : > { %v873_v62 = vpop.f32.mrb[8].mxu1  ;;  %v1068_v63 = vpop.f32.mrb[8].mxu0 }
  0xf8   : > { %v1070_v0 = vpop.f32.mrb[9].mxu1  ;;  %v1072_v1 = vpop.f32.mrb[9].mxu0 }
  0xf9   : > { %v874_v2 = vpop.f32.mrb[10].mxu1  ;;  %v902_v3 = vpop.f32.mrb[10].mxu0 }
  0xfa   : > { %v1074_v4 = vpop.f32.mrb[11].mxu1  ;;  %v1076_v5 = vpop.f32.mrb[11].mxu0 }
  0xff   : > { %v879_v6 = vpop.f32.mrb[0].mxu1  ;;  %v907_v7 = vpop.f32.mrb[0].mxu0 }
 0x100   : > { %v917_v9 = vadd.f32 %v907_v7, %v879_v6  ;;  %v377_v10 = vpop.f32.mrb[1].mxu1  ;;  %v636_v11 = vpop.f32.mrb[1].mxu0 }
 0x101   : > { %v918_v12 = vadd.f32 %v636_v11, %v377_v10  ;;  %v880_v13 = vpop.f32.mrb[2].mxu1  ;;  %v908_v14 = vpop.f32.mrb[2].mxu0 }
 0x102   : > { %v702_v15 = vadd.f32 %v917_v9, %v1081_v8  ;;  %v919_v16 = vadd.f32 %v908_v14, %v880_v13  ;;  %v380_v17 = vpop.f32.mrb[3].mxu1  ;;  %v639_v18 = vpop.f32.mrb[3].mxu0 }
 0x103   : > { %v700_v19 = vadd.f32 %v918_v12, %v1081_v8  ;;  %v920_v20 = vadd.f32 %v639_v18, %v380_v17 }
 0x104   : > { %v713_v21 = vmax.f32 %v702_v15, 0.0  ;;  %v703_v22 = vadd.f32 %v919_v16, %v1081_v8 }
 0x105   : > { %v711_v23 = vmax.f32 %v700_v19, 0.0  ;;  %v701_v24 = vadd.f32 %v920_v20, %v1081_v8 }
 0x106   : > { %724 = vst [vmem:[%s1087_s6 + $0x10] sm:$0xff] %v713_v21  ;;  %v714_v25 = vmax.f32 %v703_v22, 0.0 }
 0x107   : > { %722 = vst [vmem:[%s1087_s6] sm:$0xff] %v711_v23  ;;  %v712_v26 = vmax.f32 %v701_v24, 0.0  ;;  %v883_v27 = vpop.f32.mrb[4].mxu1  ;;  %v911_v28 = vpop.f32.mrb[4].mxu0 }
 0x108   : > { %725 = vst [vmem:[%s1087_s6 + $0x18] sm:$0xff] %v714_v25  ;;  %v921_v29 = vadd.f32 %v911_v28, %v883_v27  ;;  %v393_v30 = vpop.f32.mrb[5].mxu1  ;;  %v652_v31 = vpop.f32.mrb[5].mxu0 }
 0x109   : > { %723 = vst [vmem:[%s1087_s6 + $0x8] sm:$0xff] %v712_v26  ;;  %v922_v32 = vadd.f32 %v652_v31, %v393_v30  ;;  %v884_v33 = vpop.f32.mrb[6].mxu1  ;;  %v912_v34 = vpop.f32.mrb[6].mxu0 }
 0x10a   : > { %v706_v35 = vadd.f32 %v921_v29, %v1081_v8  ;;  %v923_v36 = vadd.f32 %v912_v34, %v884_v33  ;;  %v396_v37 = vpop.f32.mrb[7].mxu1  ;;  %v655_v38 = vpop.f32.mrb[7].mxu0 }
 0x10b   : > { %v704_v39 = vadd.f32 %v922_v32, %v1081_v8  ;;  %v924_v40 = vadd.f32 %v655_v38, %v396_v37 }
 0x10c   : > { %v717_v41 = vmax.f32 %v706_v35, 0.0  ;;  %v707_v42 = vadd.f32 %v923_v36, %v1081_v8 }
 0x10d   : > { %v715_v43 = vmax.f32 %v704_v39, 0.0  ;;  %v705_v44 = vadd.f32 %v924_v40, %v1081_v8 }
 0x10e   : > { %728 = vst [vmem:[%s1087_s6 + $0x30] sm:$0xff] %v717_v41  ;;  %v718_v45 = vmax.f32 %v707_v42, 0.0 }
 0x10f   : > { %726 = vst [vmem:[%s1087_s6 + $0x20] sm:$0xff] %v715_v43  ;;  %v716_v46 = vmax.f32 %v705_v44, 0.0  ;;  %v887_v47 = vpop.f32.mrb[12].mxu1  ;;  %v915_v48 = vpop.f32.mrb[12].mxu0 }
 0x110   : > { %729 = vst [vmem:[%s1087_s6 + $0x38] sm:$0xff] %v718_v45  ;;  %v418_v49 = vadd.f32 %v887_v47, %v873_v62  ;;  %v409_v50 = vpop.f32.mrb[13].mxu1  ;;  %v668_v51 = vpop.f32.mrb[13].mxu0 }
 0x111   : > { %727 = vst [vmem:[%s1087_s6 + $0x28] sm:$0xff] %v716_v46  ;;  %v410_v52 = vadd.f32 %v409_v50, %v1070_v0  ;;  %v888_v53 = vpop.f32.mrb[14].mxu1  ;;  %v916_v54 = vpop.f32.mrb[14].mxu0 }
 0x112   : > { %v557_v55 = vadd.f32 %v1068_v63, %v418_v49  ;;  %v412_v56 = vpop.f32.mrb[15].mxu1  ;;  %v671_v57 = vpop.f32.mrb[15].mxu0 }
 0x113   : > { %v555_v58 = vadd.f32 %v1072_v1, %v410_v52  ;;  %v413_v59 = vadd.f32 %v412_v56, %v1074_v4 }
 0x114   : > { %v692_v60 = vadd.f32 %v915_v48, %v557_v55 }
 0x115   : > { %v690_v61 = vadd.f32 %v668_v51, %v555_v58  ;;  %v556_v62 = vadd.f32 %v1076_v5, %v413_v59 }
 0x116   : > { %v710_v2 = vadd.f32 %v1081_v8, %v692_v60 }
 0x117   : > { %v708_v0 = vadd.f32 %v1081_v8, %v690_v61  ;;  %v691_v3 = vadd.f32 %v671_v57, %v556_v62 }
 0x118   : > { %v721_v6 = vmax.f32 %v710_v2, 0.0 }
 0x119   : > { %v719_v7 = vmax.f32 %v708_v0, 0.0  ;;  %v709_v63 = vadd.f32 %v1081_v8, %v691_v3 }
 0x11a   : > { %732 = vst [vmem:[%s1087_s6 + $0x50] sm:$0xff] %v721_v6 }
 0x11b   : > { %730 = vst [vmem:[%s1087_s6 + $0x40] sm:$0xff] %v719_v7  ;;  %v720_v9 = vmax.f32 %v709_v63, 0.0 }
 0x11d   : > { %731 = vst [vmem:[%s1087_s6 + $0x48] sm:$0xff] %v720_v9 }
 0x11e PF: > { %s13_s12 = sadd.s32 1, %s959_s12  }
 0x11f   : > { %p10_p5 = scmp.ge.s32.totalorder %s13_s12, 4  }
 0x121   :  { %12 = sbr.rel (!%p10_p5) target bundleno = 1 (0x1), region = 65 }

// kernel: encoder_forward.5
= control target key start
LH: loop header
LB: loop body
LE: loop exit
PB: predicated region body
PF: predicated region fallthrough
CT: control target
= control target key end

     0   :  { %s2712_s12 = smov 0   ;;  %s3298_s0 = inlined_call_operand.vmem [shape: f32[80,512], index: 0, kind: input, shape index: {}]   ;;  %s3299_s1 = inlined_call_operand.vmem [shape: bf16[4,512,128], index: 1, kind: input, shape index: {}]   ;;  %s3300_s2 = inlined_call_operand.vmem [shape: f32[1,128], index: 2, kind: input, shape index: {}]   ;;  %s3301_s3 = inlined_call_operand.vmem [shape: f32[64,128], index: 3, kind: output, shape index: {}]  }
   0x1 LB: > { %s1987_s13 = sadd.s32 4294967295, %s2690_s12   ;;  %p1991_p0 = scmp.ge.s32.totalorder %s2690_s12, 1  ;;  %s2690_s12 = sphi %s2712_s12, %s13_s12  }
   0x2   : > { %p139_p1 = scmp.lt.s32.totalorder %s2690_s12, 3 }
   0x4   : > { %p140_p2 = pnand %p1991_p0, %p139_p1 }
   0x5   : > { %v2552_v0 = vld [vmem:[%s3299_s1 + $0x140] sm:$0xff] (!%p140_p2)   ;;  %v2556_v4 = vld [vmem:[%s3299_s1 + $0x148] sm:$0xff] (!%p140_p2)   ;;  %v2560_v8 = vld [vmem:[%s3299_s1 + $0x150] sm:$0xff] (!%p140_p2)   ;;  %s164_s19 = smul.u32 (!%p140_p2), 5, %s1987_s13  ;;  %vm363_vm0 = vsmask.f32 (!%p140_p2), 7424 }
   0x6   : > { %143 = sbr.rel (%p140_p2) target bundleno = 368 (0x170), region = 32  ;;  %v2553_v1 = vld [vmem:[%s3299_s1 + $0x1c0] sm:$0xff] (!%p140_p2)   ;;  %2320 = vmatprep.subr.bf16.mxu0 (!%p140_p2), %v2552_v0  ;;  %v2557_v5 = vld [vmem:[%s3299_s1 + $0x1c8] sm:$0xff] (!%p140_p2)   ;;  %v2561_v9 = vld [vmem:[%s3299_s1 + $0x1d0] sm:$0xff] (!%p140_p2)   ;;  %vm1113_vm1 = vsmask.f32 (!%p140_p2), 5376 }
   0x7   : > { %v2554_v2 = vld [vmem:[%s3299_s1 + $0x100] sm:$0xff] (!%p140_p2)   ;;  %2348 = vmatprep.subr.bf16.mxu1 (!%p140_p2), %v2553_v1  ;;  %v2558_v6 = vld [vmem:[%s3299_s1 + $0x108] sm:$0xff] (!%p140_p2)   ;;  %v2562_v10 = vld [vmem:[%s3299_s1 + $0x110] sm:$0xff] (!%p140_p2)   ;;  %p165_p3 = scmp.lt.s32.totalorder (!%p140_p2), %s164_s19, 9  ;;  %vm1593_vm2 = vcmask (!%p140_p2), 1044480  }
   0x8   : > { %v2555_v3 = vld [vmem:[%s3299_s1 + $0x180] sm:$0xff] (!%p140_p2)   ;;  %2321 = vmatpush3.bf16.msra.mxu0 (!%p140_p2), %v2554_v2  ;;  %v2559_v7 = vld [vmem:[%s3299_s1 + $0x188] sm:$0xff] (!%p140_p2)   ;;  %v2563_v11 = vld [vmem:[%s3299_s1 + $0x190] sm:$0xff] (!%p140_p2)  }
   0x9   : > { %2349 = vmatpush3.bf16.msra.mxu1 (!%p140_p2), %v2555_v3  ;;  %2322 = vmatprep.subr.bf16.mxu0 (!%p140_p2), %v2556_v4  ;;  %v2564_v12 = vld [vmem:[%s3299_s1 + $0x158] sm:$0xff] (!%p140_p2)   ;;  %v2568_v16 = vld [vmem:[%s3299_s1 + $0x160] sm:$0xff] (!%p140_p2)   ;;  %v2572_v20 = vld [vmem:[%s3299_s1 + $0x168] sm:$0xff] (!%p140_p2)  }
   0xa   : > { %2350 = vmatprep.subr.bf16.mxu1 (!%p140_p2), %v2557_v5  ;;  %v2565_v13 = vld [vmem:[%s3299_s1 + $0x1d8] sm:$0xff] (!%p140_p2)   ;;  %v2569_v17 = vld [vmem:[%s3299_s1 + $0x1e0] sm:$0xff] (!%p140_p2)   ;;  %v2573_v21 = vld [vmem:[%s3299_s1 + $0x1e8] sm:$0xff] (!%p140_p2)  }
   0xb   : > { %v2566_v14 = vld [vmem:[%s3299_s1 + $0x118] sm:$0xff] (!%p140_p2)   ;;  %v2570_v18 = vld [vmem:[%s3299_s1 + $0x120] sm:$0xff] (!%p140_p2)   ;;  %v2574_v22 = vld [vmem:[%s3299_s1 + $0x128] sm:$0xff] (!%p140_p2)  }
   0xc   : > { %2323 = vmatpush3.bf16.msra.mxu0 (!%p140_p2), %v2558_v6  ;;  %v2567_v15 = vld [vmem:[%s3299_s1 + $0x198] sm:$0xff] (!%p140_p2)   ;;  %v2571_v19 = vld [vmem:[%s3299_s1 + $0x1a0] sm:$0xff] (!%p140_p2)   ;;  %v2575_v23 = vld [vmem:[%s3299_s1 + $0x1a8] sm:$0xff] (!%p140_p2)  }
   0xd   : > { %2351 = vmatpush3.bf16.msra.mxu1 %v2559_v7  ;;  %2324 = vmatprep.subr.bf16.mxu0 %v2560_v8  ;;  %s3303_s19 = smov (!%p165_p3, %s164_s19), 9  ;;  %v2576_v24 = vld [vmem:[%s3299_s1 + $0x170] sm:$0xff]   ;;  %v2580_v28 = vld [vmem:[%s3299_s1 + $0x178] sm:$0xff]   ;;  %v2584_v6 = vld [vmem:[%s3299_s1 + $0x40] sm:$0xff]  }
   0xe   : > { %2352 = vmatprep.subr.bf16.mxu1 %v2561_v9  ;;  %v2577_v25 = vld [vmem:[%s3299_s1 + $0x1f0] sm:$0xff]   ;;  %s2319_s20 = sshll.u32 %s3303_s19, 5  ;;  %v2581_v29 = vld [vmem:[%s3299_s1 + $0x1f8] sm:$0xff]   ;;  %v2585_v7 = vld [vmem:[%s3299_s1 + $0xc0] sm:$0xff]  }
   0xf   : > { %v2578_v26 = vld [vmem:[%s3299_s1 + $0x130] sm:$0xff]   ;;  %s2815_s29 = scalar_lea.vmem %s3298_s0, %s2319_s20  ;;  %v2582_v30 = vld [vmem:[%s3299_s1 + $0x138] sm:$0xff]  }
  0x10   : > { %2325 = vmatpush3.bf16.msra.mxu0 %v2562_v10  ;;  %v2579_v27 = vld [vmem:[%s3299_s1 + $0x1b0] sm:$0xff]   ;;  %v2583_v31 = vld [vmem:[%s3299_s1 + $0x1b8] sm:$0xff]   ;;  %v267_v32 = vld [vmem:[%s2815_s29 + $0x8] sm:$0xfe] }
  0x11   : > { %2353 = vmatpush3.bf16.msra.mxu1 %v2563_v11  ;;  %2326 = vmatprep.subr.bf16.mxu0 %v2564_v12  ;;  %v2825_v33 = vld [vmem:[%s2815_s29 + $0x28] sm:$0xff]  ;;  %v269_v37 = vld [vmem:[%s2815_s29 + $0x18] sm:$0xfe]  ;;  %v266_v43 = vld [vmem:[%s2815_s29] sm:$0xfe] }
  0x12   : > { %2354 = vmatprep.subr.bf16.mxu1 %v2565_v13  ;;  %v275_v34 = vld [vmem:[%s2815_s29 + $0x48] sm:$0xff]  ;;  %v287_v36 = vpack.c.bf16 %v2825_v33, %v267_v32  ;;  %v2832_v38 = vld [vmem:[%s2815_s29 + $0x38] sm:$0xff]  ;;  %v2843_v47 = vld [vmem:[%s2815_s29 + $0x20] sm:$0xff] }
  0x13   : > { %v279_v35 = vld [vmem:[%s2815_s29 + $0x68] sm:$0xff]  ;;  %v277_v40 = vld [vmem:[%s2815_s29 + $0x58] sm:$0xff]  ;;  %v289_v42 = vpack.c.bf16 %v2832_v38, %v269_v37  ;;  %v274_v48 = vld [vmem:[%s2815_s29 + $0x40] sm:$0xff]  ;;  %v286_v53 = vpack.c.bf16 %v2843_v47, %v266_v43 }
  0x14   : > { %2327 = vmatpush3.bf16.msra.mxu0 %v2566_v14  ;;  %v2834_v39 = vpack.c.bf16 %v279_v35, %v275_v34  ;;  %v281_v41 = vld [vmem:[%s2815_s29 + $0x78] sm:$0xff]  ;;  %v377_v44 = vshrl.u32 %v287_v36, 16  ;;  %v379_v45 = vshll.u32 %v287_v36, 16  ;;  %v278_v49 = vld [vmem:[%s2815_s29 + $0x60] sm:$0xff]  ;;  %v268_v54 = vld [vmem:[%s2815_s29 + $0x10] sm:$0xfe] }
  0x15   : > { %2355 = vmatpush3.bf16.msra.mxu1 %v2567_v15  ;;  %2328 = vmatprep.subr.bf16.mxu0 %v2568_v16  ;;  %v2840_v46 = vpack.c.bf16 %v281_v41, %v277_v40  ;;  %v401_v51 = vshrl.u32 %v289_v42, 16  ;;  %v403_v52 = vshll.u32 %v289_v42, 16  ;;  %v2851_v55 = vld [vmem:[%s2815_s29 + $0x30] sm:$0xff]  ;;  %v2854_v58 = vpack.c.bf16 %v278_v49, %v274_v48  ;;  %v2586_v15 = vld [vmem:[%s3299_s1] sm:$0xff]   ;;  %v2596_v32 = vld [vmem:[%s3299_s1 + $0x58] sm:$0xff]  }
  0x16   : > { %2356 = vmatprep.subr.bf16.mxu1 %v2569_v17  ;;  %v384_v50 = vshll.u32 %v2834_v39, 16  ;;  %v381_v56 = vrot.slane %v379_v45, 1  ;;  %v276_v59 = vld [vmem:[%s2815_s29 + $0x50] sm:$0xff]  ;;  %v288_v61 = vpack.c.bf16 %v2851_v55, %v268_v54  ;;  %v365_v0 = vshrl.u32 %v286_v53, 16  ;;  %v2597_v34 = vld [vmem:[%s3299_s1 + $0xd8] sm:$0xff]   ;;  %v2600_v37 = vld [vmem:[%s3299_s1 + $0x60] sm:$0xff]  }
  0x17   : > { %v408_v57 = vshll.u32 %v2840_v46, 16  ;;  %v280_v60 = vld [vmem:[%s2815_s29 + $0x70] sm:$0xff]  ;;  %v405_v63 = vrot.slane %v403_v52, 1  ;;  %v367_v1 = vshll.u32 %v286_v53, 16  ;;  %v372_v4 = vshll.u32 %v2854_v58, 16  ;;  %v2598_v35 = vld [vmem:[%s3299_s1 + $0x18] sm:$0xff]  }
  0x18   : > { %2329 = vmatpush3.bf16.msra.mxu0 %v2570_v18  ;;  %v2861_v62 = vrot.slane %v384_v50, 1  ;;  %v382_v2 = vor.u32 %v381_v56, %v377_v44  ;;  %v2868_v5 = vpack.c.bf16 %v280_v60, %v276_v59  ;;  %v389_v10 = vshrl.u32 %v288_v61, 16  ;;  %v2599_v36 = vld [vmem:[%s3299_s1 + $0x98] sm:$0xff]   ;;  %v2601_v40 = vld [vmem:[%s3299_s1 + $0xe0] sm:$0xff]   ;;  %v2604_v44 = vld [vmem:[%s3299_s1 + $0x68] sm:$0xff]  }
  0x19   : > { %2357 = vmatpush3.bf16.msra.mxu1 %v2571_v19  ;;  %2330 = vmatprep.subr.bf16.mxu0 %v2572_v20  ;;  %v2865_v3 = vrot.slane %v408_v57, 1  ;;  %v406_v8 = vor.u32 %v405_v63, %v401_v51  ;;  %v369_v9 = vrot.slane %v367_v1, 1  ;;  %v391_v11 = vshll.u32 %v288_v61, 16  ;;  %v2587_v19 = vld [vmem:[%s3299_s1 + $0x80] sm:$0xff]   ;;  %v2605_v48 = vld [vmem:[%s3299_s1 + $0xe8] sm:$0xff]  }
  0x1a   : > { %2358 = vmatprep.subr.bf16.mxu1 %v2573_v21  ;;  %v387_v12 = vsel %vm363_vm0, %v382_v2, %v2861_v62  ;;  %v2880_v13 = vrot.slane %v372_v4, 1  ;;  %v396_v14 = vshll.u32 %v2868_v5, 16  ;;  %v2588_v21 = vld [vmem:[%s3299_s1 + $0x48] sm:$0xff]   ;;  %v2602_v41 = vld [vmem:[%s3299_s1 + $0x20] sm:$0xff]   ;;  %v420_v43 = vshrl.u32 %v2834_v39, 16 }
  0x1b   : > { %676 = vmatprep.mubr.bf16.mxu0 %v387_v12  ;;  %v411_v16 = vsel %vm363_vm0, %v406_v8, %v2865_v3  ;;  %v370_v17 = vor.u32 %v369_v9, %v365_v0  ;;  %v393_v18 = vrot.slane %v391_v11, 1  ;;  %v2603_v42 = vld [vmem:[%s3299_s1 + $0xa0] sm:$0xff]   ;;  %v436_v45 = vshrl.u32 %v2840_v46, 16  ;;  %v283_v49 = vld [vmem:[%s2815_s29 + $0x88] sm:$0x1]  ;;  %v2608_v9 = vld [vmem:[%s3299_s1 + $0x70] sm:$0xff]  }
  0x1c   : > { %2331 = vmatpush3.bf16.msra.mxu0 %v2574_v22  ;;  %725 = vmatprep.mubr.bf16.mxu1 %v411_v16  ;;  %v2893_v20 = vrot.slane %v396_v14, 1  ;;  %v285_v51 = vld [vmem:[%s2815_s29 + $0x98] sm:$0x1]  ;;  %v295_v52 = vpack.c.bf16 %v283_v49, %v283_v49  ;;  %v2606_v54 = vld [vmem:[%s3299_s1 + $0x28] sm:$0xff]   ;;  %v412_v56 = vshrl.u32 %v2854_v58, 16  ;;  %v428_v60 = vshrl.u32 %v2868_v5, 16 }
  0x1d   : > { %2359 = vmatpush3.bf16.msra.mxu1 %v2575_v23  ;;  %2332 = vmatprep.subr.bf16.mxu0 %v2576_v24  ;;  %v375_v22 = vsel %vm363_vm0, %v370_v17, %v2880_v13  ;;  %v394_v23 = vor.u32 %v393_v18, %v389_v10  ;;  %v2589_v24 = vld [vmem:[%s3299_s1 + $0xc8] sm:$0xff]   ;;  %v297_v53 = vpack.c.bf16 %v285_v51, %v285_v51  ;;  %v282_v2 = vld [vmem:[%s2815_s29 + $0x80] sm:$0x1]  ;;  %v2609_v16 = vld [vmem:[%s3299_s1 + $0xf0] sm:$0xff]  }
  0x1e   : > { %2360 = vmatprep.subr.bf16.mxu1 %v2577_v25  ;;  %v2607_v59 = vld [vmem:[%s3299_s1 + $0xa8] sm:$0xff]   ;;  %v422_v61 = vor.u32 %v420_v43, %v2861_v62  ;;  %v424_v63 = vshll.u32 %v295_v52, 16  ;;  %v438_v0 = vor.u32 %v436_v45, %v2865_v3  ;;  %v414_v62 = vor.u32 %v412_v56, %v2880_v13  ;;  %v2610_v17 = vld [vmem:[%s3299_s1 + $0x30] sm:$0xff]  }
  0x1f   : > { %v399_v25 = vsel %vm363_vm0, %v394_v23, %v2893_v20  ;;  %v440_v1 = vshll.u32 %v297_v53, 16  ;;  %v430_v3 = vor.u32 %v428_v60, %v2893_v20  ;;  %v2622_v49 = vld [vmem:[%s3299_s1 + $0x208] sm:$0xff]   ;;  %v2624_v52 = vld [vmem:[%s3299_s1 + $0x250] sm:$0xff]  }
  0x20   : > { %2333 = vmatpush3.bf16.msra.mxu0 %v2578_v26  ;;  %v2590_v26 = vld [vmem:[%s3299_s1 + $0x8] sm:$0xff]   ;;  %v426_v10 = vrot.slane %v424_v63, 1  ;;  %v2625_v53 = vld [vmem:[%s3299_s1 + $0x2d0] sm:$0xff]   ;;  %v2629_v63 = vld [vmem:[%s3299_s1 + $0x2d8] sm:$0xff]  }
  0x21   : > { %2361 = vmatpush3.bf16.msra.mxu1 %v2579_v27  ;;  %2334 = vmatprep.subr.bf16.mxu0 %v2580_v28  ;;  %v2591_v27 = vld [vmem:[%s3299_s1 + $0x88] sm:$0xff]   ;;  %v2592_v28 = vld [vmem:[%s3299_s1 + $0x50] sm:$0xff]   ;;  %v442_v11 = vrot.slane %v440_v1, 1  ;;  %v2631_v1 = vld [vmem:[%s3299_s1 + $0x298] sm:$0xff]  }
  0x22   : > { %2362 = vmatprep.subr.bf16.mxu1 %v2581_v29  ;;  %v2593_v29 = vld [vmem:[%s3299_s1 + $0xd0] sm:$0xff]   ;;  %v427_v18 = vsel %vm363_vm0, %v422_v61, %v426_v10  ;;  %v2623_v51 = vld [vmem:[%s3299_s1 + $0x288] sm:$0xff]   ;;  %v2628_v61 = vld [vmem:[%s3299_s1 + $0x258] sm:$0xff]  }
  0x23   : > { %v2637_v10 = vld [vmem:[%s3299_s1 + $0x2e8] sm:$0xff]  }
  0x24   : > { %2335 = vmatpush3.bf16.msra.mxu0 %v2582_v30  ;;  %v2594_v30 = vld [vmem:[%s3299_s1 + $0x10] sm:$0xff]  }
  0x25   : > { %2363 = vmatpush3.bf16.msra.mxu1 %v2583_v31  ;;  %2376 = vmatprep.subr.bf16.mxu0 %v2584_v6  ;;  %v2595_v31 = vld [vmem:[%s3299_s1 + $0x90] sm:$0xff]  }
  0x26   : > { %2404 = vmatprep.subr.bf16.mxu1 %v2585_v7  ;;  %v284_v6 = vld [vmem:[%s2815_s29 + $0x90] sm:$0x1]  ;;  %v294_v7 = vpack.c.bf16 %v282_v2, %v282_v2  ;;  %v2632_v2 = vld [vmem:[%s3299_s1 + $0x260] sm:$0xff]  }
  0x27   : > { %677 = vmatmul.mubr.bf16.vlgmr.msra.gmra.mrb[0].mxu0 %v375_v22  ;;  %v296_v8 = vpack.c.bf16 %v284_v6, %v284_v6  ;;  %v2612_v22 = vld [vmem:[%s3299_s1 + $0x78] sm:$0xff]   ;;  %v2633_v6 = vld [vmem:[%s3299_s1 + $0x2e0] sm:$0xff]  }
  0x28   : > { %2377 = vmatpush3.bf16.msra.mxu0 %v2586_v15  ;;  %726 = vmatmul.mubr.bf16.vlgmr.msra.gmra.mrb[0].mxu1 %v399_v25  ;;  %v416_v12 = vshll.u32 %v294_v7, 16  ;;  %v2613_v25 = vld [vmem:[%s3299_s1 + $0xf8] sm:$0xff]   ;;  %v2634_v7 = vld [vmem:[%s3299_s1 + $0x220] sm:$0xff]  }
  0x29   : > { %2378 = vmatprep.subr.bf16.mxu0 %v2588_v21  ;;  %2405 = vmatpush3.bf16.msra.mxu1 %v2587_v19  ;;  %v432_v15 = vshll.u32 %v296_v8, 16  ;;  %v443_v19 = vsel %vm363_vm0, %v438_v0, %v442_v11  ;;  %v2611_v21 = vld [vmem:[%s3299_s1 + $0xb0] sm:$0xff]   ;;  %v2630_v0 = vld [vmem:[%s3299_s1 + $0x218] sm:$0xff]   ;;  %v2635_v8 = vld [vmem:[%s3299_s1 + $0x2a0] sm:$0xff]  }
  0x2a   : > { %2406 = vmatprep.subr.bf16.mxu1 %v2589_v24  ;;  %684 = vmatprep.mubr.bf16.mxu0 %v427_v18  ;;  %v418_v13 = vrot.slane %v416_v12, 1  ;;  %v2638_v11 = vld [vmem:[%s3299_s1 + $0x228] sm:$0xff]   ;;  %v1123_v12 = vrot.slane %v372_v4, 3  ;;  %v2642_v4 = vld [vmem:[%s3299_s1 + $0x230] sm:$0xff]   ;;  %v1134_v18 = vrot.slane %v420_v43, 2  ;;  %v2646_v43 = vld [vmem:[%s3299_s1 + $0x238] sm:$0xff]  }
  0x2b   : > { %733 = vmatprep.mubr.bf16.mxu1 %v443_v19  ;;  %v434_v20 = vrot.slane %v432_v15, 1  ;;  %v1147_v15 = vrot.slane %v396_v14, 3  ;;  %v2643_v14 = vld [vmem:[%s3299_s1 + $0x2b0] sm:$0xff]   ;;  %v1135_v19 = vrot.slane %v384_v50, 3  ;;  %v1146_v50 = vrot.slane %v428_v60, 2 }
  0x2c   : > { %2379 = vmatpush3.bf16.msra.mxu0 %v2590_v26  ;;  %v419_v23 = vsel %vm363_vm0, %v414_v62, %v418_v13  ;;  %v2614_v26 = vld [vmem:[%s3299_s1 + $0x38] sm:$0xff]   ;;  %v2639_v62 = vld [vmem:[%s3299_s1 + $0x2a8] sm:$0xff]  }
  0x2d   : > { %2380 = vmatprep.subr.bf16.mxu0 %v2592_v28  ;;  %2407 = vmatpush3.bf16.msra.mxu1 %v2591_v27  ;;  %v435_v24 = vsel %vm363_vm0, %v430_v3, %v434_v20  ;;  %v2615_v27 = vld [vmem:[%s3299_s1 + $0xb8] sm:$0xff]   ;;  %v179_v28 = vld [vmem:[%s2815_s29 + $0x8] sm:$0xff]  ;;  %v2640_v3 = vld [vmem:[%s3299_s1 + $0x270] sm:$0xff]   ;;  %v1158_v20 = vrot.slane %v436_v45, 2 }
  0x2e   : > { %2408 = vmatprep.subr.bf16.mxu1 %v2593_v29  ;;  %v181_v29 = vld [vmem:[%s2815_s29 + $0x18] sm:$0xff] }
  0x2f   : > { %685 = vmatmul.mubr.bf16.gmra.mrb[4].mxu0 %v419_v23  ;;  %v2645_v13 = vld [vmem:[%s3299_s1 + $0x2f8] sm:$0xff]   ;;  %v1033_v23 = vld [vmem:[%s2815_s29 + $0x8] sm:$0xe0] }
  0x30   : > { %2381 = vmatpush3.bf16.msra.mxu0 %v2594_v30  ;;  %734 = vmatmul.mubr.bf16.gmra.mrb[4].mxu1 %v435_v24  ;;  %v195_v30 = vpack.c.bf16 %v2825_v33, %v179_v28  ;;  %v1041_v45 = vpack.c.bf16 %v2825_v33, %v1033_v23  ;;  %v1035_v24 = vld [vmem:[%s2815_s29 + $0x18] sm:$0xe0]  ;;  %v3144_v33 = vor.u32 %v1135_v19, %v1134_v18 }
  0x31   : > { %2382 = vmatprep.subr.bf16.mxu0 %v2596_v32  ;;  %2409 = vmatpush3.bf16.msra.mxu1 %v2595_v31  ;;  %v197_v31 = vpack.c.bf16 %v2832_v38, %v181_v29  ;;  %v178_v32 = vld [vmem:[%s2815_s29] sm:$0xff] }
  0x32   : > { %2410 = vmatprep.subr.bf16.mxu1 %v2597_v34  ;;  %v180_v34 = vld [vmem:[%s2815_s29 + $0x10] sm:$0xff]  ;;  %966 = vmatprep.mubr.bf16.mxu0 %v195_v30  ;;  %v2648_v29 = vld [vmem:[%s3299_s1 + $0x340] sm:$0xff]   ;;  %v1127_v30 = vshrl.u32 %v1041_v45, 16 }
  0x33   : > { %1015 = vmatprep.mubr.bf16.mxu1 %v197_v31  ;;  %v1130_v31 = vshll.u32 %v1041_v45, 16  ;;  %v2657_v45 = vld [vmem:[%s3299_s1 + $0x3d0] sm:$0xff]  }
  0x34   : > { %2383 = vmatpush3.bf16.msra.mxu0 %v2598_v35  ;;  %v2616_v35 = vld [vmem:[%s3299_s1 + $0x240] sm:$0xff]  }
  0x35   : > { %2384 = vmatprep.subr.bf16.mxu0 %v2600_v37  ;;  %2411 = vmatpush3.bf16.msra.mxu1 %v2599_v36  ;;  %v194_v36 = vpack.c.bf16 %v2843_v47, %v178_v32  ;;  %v196_v37 = vpack.c.bf16 %v2851_v55, %v180_v34 }
  0x36   : > { %2412 = vmatprep.subr.bf16.mxu1 %v2601_v40  ;;  %v2617_v40 = vld [vmem:[%s3299_s1 + $0x2c0] sm:$0xff]  }
  0x38   : > { %2385 = vmatpush3.bf16.msra.mxu0 %v2602_v41  ;;  %v2618_v41 = vld [vmem:[%s3299_s1 + $0x200] sm:$0xff]  }
  0x39   : > { %2386 = vmatprep.subr.bf16.mxu0 %v2604_v44  ;;  %2413 = vmatpush3.bf16.msra.mxu1 %v2603_v42  ;;  %v2619_v42 = vld [vmem:[%s3299_s1 + $0x280] sm:$0xff]   ;;  %v2620_v44 = vld [vmem:[%s3299_s1 + $0x248] sm:$0xff]  }
  0x3a   : > { %2414 = vmatprep.subr.bf16.mxu1 %v2605_v48  ;;  %v2621_v48 = vld [vmem:[%s3299_s1 + $0x2c8] sm:$0xff]  }
  0x3c   : > { %2387 = vmatpush3.bf16.msra.mxu0 %v2606_v54  ;;  %v2626_v54 = vld [vmem:[%s3299_s1 + $0x210] sm:$0xff]  }
  0x3d   : > { %2388 = vmatprep.subr.bf16.mxu0 %v2608_v9  ;;  %2415 = vmatpush3.bf16.msra.mxu1 %v2607_v59  ;;  %v2627_v59 = vld [vmem:[%s3299_s1 + $0x290] sm:$0xff]   ;;  %v2636_v9 = vld [vmem:[%s3299_s1 + $0x268] sm:$0xff]  }
  0x3e   : > { %2416 = vmatprep.subr.bf16.mxu1 %v2609_v16  ;;  %v2641_v16 = vld [vmem:[%s3299_s1 + $0x2f0] sm:$0xff]  }
  0x40   : > { %2389 = vmatpush3.bf16.msra.mxu0 %v2610_v17  ;;  %v1122_v17 = vrot.slane %v412_v56, 2  ;;  %v2644_v56 = vld [vmem:[%s3299_s1 + $0x278] sm:$0xff]  }
  0x41   : > { %2390 = vmatprep.subr.bf16.mxu0 %v2612_v22  ;;  %2417 = vmatpush3.bf16.msra.mxu1 %v2611_v21  ;;  %v1159_v21 = vrot.slane %v408_v57, 3  ;;  %v2647_v22 = vld [vmem:[%s3299_s1 + $0x2b8] sm:$0xff]  }
  0x42   : > { %2418 = vmatprep.subr.bf16.mxu1 %v2613_v25  ;;  %v1032_v25 = vld [vmem:[%s2815_s29] sm:$0xe0]  ;;  %v3138_v57 = vor.u32 %v1123_v12, %v1122_v17  ;;  %v1037_v12 = vld [vmem:[%s2815_s29 + $0x88] sm:$0x1f]  ;;  %v1036_v17 = vld [vmem:[%s2815_s29 + $0x80] sm:$0x1f] }
  0x43   : > { %v1040_v28 = vpack.c.bf16 %v2843_v47, %v1032_v25  ;;  %v3146_v32 = vor.u32 %v1159_v21, %v1158_v20 }
  0x44   : > { %2391 = vmatpush3.bf16.msra.mxu0 %v2614_v26  ;;  %v1034_v26 = vld [vmem:[%s2815_s29 + $0x10] sm:$0xe0] }
  0x45   : > { %2419 = vmatpush3.bf16.msra.mxu1 %v2615_v27  ;;  %2432 = vmatprep.subr.bf16.mxu0 %v2616_v35  ;;  %v1043_v27 = vpack.c.bf16 %v2832_v38, %v1035_v24  ;;  %v1042_v60 = vpack.c.bf16 %v2851_v55, %v1034_v26  ;;  %v1115_v35 = vshrl.u32 %v1040_v28, 16  ;;  %v1118_v47 = vshll.u32 %v1040_v28, 16  ;;  %v2649_v55 = vld [vmem:[%s3299_s1 + $0x3c0] sm:$0xff]   ;;  %v2658_v24 = vld [vmem:[%s3299_s1 + $0x310] sm:$0xff]  }
  0x46   : > { %2460 = vmatprep.subr.bf16.mxu1 %v2617_v40 }
  0x47   : > { %967 = vmatmul.mubr.bf16.vlgmr.msra.gmra.mrb[8].mxu0 %v194_v36  ;;  %v1151_v34 = vshrl.u32 %v1043_v27, 16  ;;  %v1154_v38 = vshll.u32 %v1043_v27, 16  ;;  %v1129_v36 = vrot.slane %v1127_v30, 2  ;;  %v1139_v40 = vshrl.u32 %v1042_v60, 16 }
  0x48   : > { %1016 = vmatmul.mubr.bf16.vlgmr.msra.gmra.mrb[8].mxu1 %v196_v37  ;;  %2433 = vmatpush3.bf16.msra.mxu0 %v2618_v41  ;;  %v1132_v37 = vrot.slane %v1130_v31, 3  ;;  %v1142_v41 = vshll.u32 %v1042_v60, 16 }
  0x49   : > { %2461 = vmatpush3.bf16.msra.mxu1 %v2619_v42  ;;  %2434 = vmatprep.subr.bf16.mxu0 %v2620_v44  ;;  %v1153_v42 = vrot.slane %v1151_v34, 2  ;;  %v1156_v44 = vrot.slane %v1154_v38, 3 }
  0x4a   : > { %2462 = vmatprep.subr.bf16.mxu1 %v2621_v48  ;;  %974 = vmatprep.mubr.bf16.mxu0 %v2834_v39  ;;  %v1117_v48 = vrot.slane %v1115_v35, 2  ;;  %v2659_v35 = vld [vmem:[%s3299_s1 + $0x390] sm:$0xff]  }
  0x4b   : > { %1023 = vmatprep.mubr.bf16.mxu1 %v2840_v46 }
  0x4c   : > { %2435 = vmatpush3.bf16.msra.mxu0 %v2622_v49  ;;  %v1120_v49 = vrot.slane %v1118_v47, 3 }
  0x4d   : > { %2463 = vmatpush3.bf16.msra.mxu1 %v2623_v51  ;;  %2436 = vmatprep.subr.bf16.mxu0 %v2624_v52  ;;  %v2650_v51 = vld [vmem:[%s3299_s1 + $0x300] sm:$0xff]   ;;  %v1133_v52 = vor.u32 %v1132_v37, %v1129_v36  ;;  %v2660_v36 = vld [vmem:[%s3299_s1 + $0x358] sm:$0xff]  }
  0x4e   : > { %2464 = vmatprep.subr.bf16.mxu1 %v2625_v53  ;;  %v1141_v53 = vrot.slane %v1139_v40, 2 }
  0x4f   : > { %975 = vmatmul.mubr.bf16.gmra.mrb[12].mxu0 %v2854_v58 }
  0x50   : > { %1024 = vmatmul.mubr.bf16.gmra.mrb[12].mxu1 %v2868_v5  ;;  %2437 = vmatpush3.bf16.msra.mxu0 %v2626_v54  ;;  %v1144_v54 = vrot.slane %v1142_v41, 3  ;;  %v2661_v41 = vld [vmem:[%s3299_s1 + $0x3d8] sm:$0xff]  }
  0x51   : > { %2465 = vmatpush3.bf16.msra.mxu1 %v2627_v59  ;;  %2438 = vmatprep.subr.bf16.mxu0 %v2628_v61  ;;  %v3154_v59 = vor.u32 %v1147_v15, %v1146_v50  ;;  %v1157_v61 = vor.u32 %v1156_v44, %v1153_v42  ;;  %v1045_v15 = vpack.c.bf16 %v1037_v12, %v1037_v12  ;;  %v1500_v12 = vld [vmem:[%s2815_s29] sm:$0xc0] }
  0x52   : > { %2466 = vmatprep.subr.bf16.mxu1 %v2629_v63  ;;  %v1121_v63 = vor.u32 %v1120_v49, %v1117_v48  ;;  %v2664_v48 = vld [vmem:[%s3299_s1 + $0x360] sm:$0xff]  }
  0x53   : > { %v1172_v19 = vshrl.u32 %v1045_v15, 16  ;;  %v2666_v49 = vld [vmem:[%s3299_s1 + $0x320] sm:$0xff]  }
  0x54   : > { %2439 = vmatpush3.bf16.msra.mxu0 %v2630_v0  ;;  %v2651_v0 = vld [vmem:[%s3299_s1 + $0x380] sm:$0xff]  }
  0x55   : > { %2467 = vmatpush3.bf16.msra.mxu1 %v2631_v1  ;;  %2440 = vmatprep.subr.bf16.mxu0 %v2632_v2  ;;  %v1137_v1 = vsel %vm1113_vm1, %v1133_v52, %v3144_v33  ;;  %v1145_v2 = vor.u32 %v1144_v54, %v1141_v53  ;;  %v1174_v25 = vrot.slane %v1172_v19, 2  ;;  %v2668_v52 = vld [vmem:[%s3299_s1 + $0x368] sm:$0xff]   ;;  %v2683_v19 = vld [vmem:[%s2815_s29 + $0x30] sm:$0xff] }
  0x56   : > { %2468 = vmatprep.subr.bf16.mxu1 %v2633_v6  ;;  %v2652_v6 = vld [vmem:[%s3299_s1 + $0x348] sm:$0xff]   ;;  %1430 = vmatprep.mubr.bf16.mxu0 %v1137_v1  ;;  %v2675_v1 = vld [vmem:[%s3299_s1 + $0x3b0] sm:$0xff]  }
  0x57   : > { %v2669_v53 = vld [vmem:[%s3299_s1 + $0x3e8] sm:$0xff]  }
  0x58   : > { %2441 = vmatpush3.bf16.msra.mxu0 %v2634_v7  ;;  %v1161_v7 = vsel %vm1113_vm1, %v1157_v61, %v3146_v32  ;;  %v2670_v54 = vld [vmem:[%s3299_s1 + $0x328] sm:$0xff]   ;;  %v2672_v61 = vld [vmem:[%s3299_s1 + $0x370] sm:$0xff]  }
  0x59   : > { %2469 = vmatpush3.bf16.msra.mxu1 %v2635_v8  ;;  %2442 = vmatprep.subr.bf16.mxu0 %v2636_v9  ;;  %v1125_v8 = vsel %vm1113_vm1, %v1121_v63, %v3138_v57  ;;  %v2653_v9 = vld [vmem:[%s3299_s1 + $0x3c8] sm:$0xff]   ;;  %v2673_v63 = vld [vmem:[%s3299_s1 + $0x3f0] sm:$0xff]  }
  0x5a   : > { %2470 = vmatprep.subr.bf16.mxu1 %v2637_v10  ;;  %1479 = vmatprep.mubr.bf16.mxu1 %v1161_v7  ;;  %v1149_v10 = vsel %vm1113_vm1, %v1145_v2, %v3154_v59  ;;  %v2676_v2 = vld [vmem:[%s3299_s1 + $0x378] sm:$0xff]   ;;  %v1598_v7 = vrot.slane %v2834_v39, 3  ;;  %v1501_v39 = vld [vmem:[%s2815_s29 + $0x8] sm:$0xc0] }
  0x5c   : > { %2443 = vmatpush3.bf16.msra.mxu0 %v2638_v11  ;;  %v2654_v11 = vld [vmem:[%s3299_s1 + $0x308] sm:$0xff]  }
  0x5d   : > { %2471 = vmatpush3.bf16.msra.mxu1 %v2639_v62  ;;  %2444 = vmatprep.subr.bf16.mxu0 %v2640_v3  ;;  %v2655_v62 = vld [vmem:[%s3299_s1 + $0x388] sm:$0xff]   ;;  %v1039_v3 = vld [vmem:[%s2815_s29 + $0x98] sm:$0x1f] }
  0x5e   : > { %2472 = vmatprep.subr.bf16.mxu1 %v2641_v16  ;;  %v1047_v16 = vpack.c.bf16 %v1039_v3, %v1039_v3  ;;  %v2680_v3 = vld [vmem:[%s2815_s29 + $0x28] sm:$0xff] }
  0x60   : > { %2445 = vmatpush3.bf16.msra.mxu0 %v2642_v4  ;;  %v1038_v4 = vld [vmem:[%s2815_s29 + $0x90] sm:$0x1f]  ;;  %v1190_v20 = vshrl.u32 %v1047_v16, 16 }
  0x61   : > { %2473 = vmatpush3.bf16.msra.mxu1 %v2643_v14  ;;  %2446 = vmatprep.subr.bf16.mxu0 %v2644_v56  ;;  %v1044_v14 = vpack.c.bf16 %v1036_v17, %v1036_v17  ;;  %v1046_v18 = vpack.c.bf16 %v1038_v4, %v1038_v4  ;;  %v2656_v56 = vld [vmem:[%s3299_s1 + $0x350] sm:$0xff]   ;;  %v2682_v17 = vld [vmem:[%s2815_s29 + $0x20] sm:$0xff] }
  0x62   : > { %2474 = vmatprep.subr.bf16.mxu1 %v2645_v13  ;;  %v1175_v13 = vshll.u32 %v1045_v15, 16  ;;  %v1192_v27 = vrot.slane %v1190_v20, 2  ;;  %v1509_v15 = vpack.c.bf16 %v2680_v3, %v1501_v39  ;;  %v1508_v4 = vpack.c.bf16 %v2682_v17, %v1500_v12 }
  0x63   : > { %v1163_v21 = vshrl.u32 %v1044_v14, 16  ;;  %v1166_v50 = vshll.u32 %v1044_v14, 16  ;;  %v1184_v23 = vshll.u32 %v1046_v18, 16  ;;  %v1502_v14 = vld [vmem:[%s2815_s29 + $0x10] sm:$0xc0] }
  0x64   : > { %2447 = vmatpush3.bf16.msra.mxu0 %v2646_v43  ;;  %v1193_v43 = vshll.u32 %v1047_v16, 16  ;;  %v1177_v26 = vrot.slane %v1175_v13, 3  ;;  %v1510_v13 = vpack.c.bf16 %v2683_v19, %v1502_v14 }
  0x65   : > { %2475 = vmatpush3.bf16.msra.mxu1 %v2647_v22  ;;  %2488 = vmatprep.subr.bf16.mxu0 %v2648_v29  ;;  %v1181_v22 = vshrl.u32 %v1046_v18, 16  ;;  %v1165_v60 = vrot.slane %v1163_v21, 2  ;;  %v1168_v29 = vrot.slane %v1166_v50, 3  ;;  %v1186_v31 = vrot.slane %v1184_v23, 3  ;;  %v1505_v18 = vld [vmem:[%s2815_s29 + $0x88] sm:$0x3f] }
  0x66   : > { %2516 = vmatprep.subr.bf16.mxu1 %v2649_v55  ;;  %v1195_v28 = vrot.slane %v1193_v43, 3  ;;  %v1178_v34 = vor.u32 %v1177_v26, %v1174_v25  ;;  %v1513_v20 = vpack.c.bf16 %v1505_v18, %v1505_v18  ;;  %v1504_v21 = vld [vmem:[%s2815_s29 + $0x80] sm:$0x3f]  ;;  %v1506_v50 = vld [vmem:[%s2815_s29 + $0x90] sm:$0x3f]  ;;  %v1600_v25 = vrot.slane %v1510_v13, 3 }
  0x67   : > { %1431 = vmatmul.mubr.bf16.vlgmr.msra.gmra.mrb[16].mxu0 %v1125_v8  ;;  %v1183_v30 = vrot.slane %v1181_v22, 2  ;;  %v1169_v47 = vor.u32 %v1168_v29, %v1165_v60  ;;  %v2678_v8 = vld [vmem:[%s3299_s1 + $0x338] sm:$0xff]   ;;  %v1597_v22 = vrot.slane %v1509_v15, 3 }
  0x68   : > { %1480 = vmatmul.mubr.bf16.vlgmr.msra.gmra.mrb[16].mxu1 %v1149_v10  ;;  %2489 = vmatpush3.bf16.msra.mxu0 %v2650_v51  ;;  %v1196_v38 = vor.u32 %v1195_v28, %v1192_v27  ;;  %v1179_v37 = vsel %vm1113_vm1, %v3144_v33, %v1178_v34  ;;  %v2662_v33 = vld [vmem:[%s3299_s1 + $0x318] sm:$0xff]   ;;  %v2667_v51 = vld [vmem:[%s3299_s1 + $0x3a0] sm:$0xff]   ;;  %v1608_v26 = vrot.slane %v1513_v20, 3  ;;  %v1514_v28 = vpack.c.bf16 %v1506_v50, %v1506_v50 }
  0x69   : > { %2517 = vmatpush3.bf16.msra.mxu1 %v2651_v0  ;;  %2490 = vmatprep.subr.bf16.mxu0 %v2652_v6  ;;  %v1187_v55 = vor.u32 %v1186_v31, %v1183_v30  ;;  %v1170_v42 = vsel %vm1113_vm1, %v3138_v57, %v1169_v47  ;;  %v2665_v57 = vld [vmem:[%s3299_s1 + $0x3e0] sm:$0xff]   ;;  %v2674_v0 = vld [vmem:[%s3299_s1 + $0x330] sm:$0xff]   ;;  %v2677_v6 = vld [vmem:[%s3299_s1 + $0x3f8] sm:$0xff]   ;;  %v1599_v60 = vsel %vm1593_vm2, %v1597_v22, %v1598_v7 }
  0x6a   : > { %2518 = vmatprep.subr.bf16.mxu1 %v2653_v9  ;;  %v1197_v40 = vsel %vm1113_vm1, %v3146_v32, %v1196_v38  ;;  %1438 = vmatprep.mubr.bf16.mxu0 %v1179_v37  ;;  %v2663_v32 = vld [vmem:[%s3299_s1 + $0x398] sm:$0xff]   ;;  %v1604_v9 = vrot.slane %v2840_v46, 3  ;;  %v1609_v31 = vsel %vm1593_vm2, %v1598_v7, %v1608_v26 }
  0x6b   : > { %1487 = vmatprep.mubr.bf16.mxu1 %v1197_v40  ;;  %v1188_v44 = vsel %vm1113_vm1, %v3154_v59, %v1187_v55  ;;  %v2671_v59 = vld [vmem:[%s3299_s1 + $0x3a8] sm:$0xff]   ;;  %v2679_v10 = vld [vmem:[%s3299_s1 + $0x3b8] sm:$0xff]  }
  0x6c   : > { %2491 = vmatpush3.bf16.msra.mxu0 %v2654_v11  ;;  %v1595_v11 = vrot.slane %v2854_v58, 3  ;;  %v2681_v46 = vld [vmem:[%s2815_s29 + $0x38] sm:$0xff]  ;;  %v1601_v58 = vrot.slane %v2868_v5, 3 }
  0x6d   : > { %2519 = vmatpush3.bf16.msra.mxu1 %v2655_v62  ;;  %2492 = vmatprep.subr.bf16.mxu0 %v2656_v56  ;;  %v1503_v62 = vld [vmem:[%s2815_s29 + $0x18] sm:$0xc0]  ;;  %v1507_v56 = vld [vmem:[%s2815_s29 + $0x98] sm:$0x3f]  ;;  %s1994_s29 = sshll.u32 %s1987_s13, 2 }
  0x6e   : > { %2520 = vmatprep.subr.bf16.mxu1 %v2657_v45  ;;  %v1511_v16 = vpack.c.bf16 %v2681_v46, %v1503_v62  ;;  %v1515_v43 = vpack.c.bf16 %v1507_v56, %v1507_v56  ;;  %v1594_v45 = vrot.slane %v1508_v4, 3  ;;  %v1602_v5 = vsel %vm1593_vm2, %v1600_v25, %v1601_v58  ;;  %p172_p4 = scmp.lt.s32.totalorder %s1994_s29, 7 }
  0x6f   : > { %1439 = vmatmul.mubr.bf16.gmra.mrb[20].mxu0 %v1170_v42 }
  0x70   : > { %2493 = vmatpush3.bf16.msra.mxu0 %v2658_v24  ;;  %1488 = vmatmul.mubr.bf16.gmra.mrb[20].mxu1 %v1188_v44  ;;  %v1603_v23 = vrot.slane %v1511_v16, 3  ;;  %v1512_v24 = vpack.c.bf16 %v1504_v21, %v1504_v21  ;;  %v1612_v27 = vrot.slane %v1515_v43, 3  ;;  %v1596_v30 = vsel %vm1593_vm2, %v1594_v45, %v1595_v11  ;;  %s3305_s29 = smov (!%p172_p4, %s1994_s29), 7 }
  0x71   : > { %2521 = vmatpush3.bf16.msra.mxu1 %v2659_v35  ;;  %2494 = vmatprep.subr.bf16.mxu0 %v2660_v36  ;;  %v1610_v35 = vrot.slane %v1514_v28, 3  ;;  %s1995_s6 = sshll.u32 %s3305_s29, 3 }
  0x72   : > { %2522 = vmatprep.subr.bf16.mxu1 %v2661_v41  ;;  %v1605_v29 = vsel %vm1593_vm2, %v1603_v23, %v1604_v9  ;;  %1846 = vmatprep.mubr.bf16.mxu0 %v1599_v60  ;;  %v1613_v34 = vsel %vm1593_vm2, %v1604_v9, %v1612_v27  ;;  %v1606_v38 = vrot.slane %v1512_v24, 3  ;;  %s175_s10 = scalar_lea.vmem %s3301_s3, %s1995_s6 }
  0x73   : > { %1895 = vmatprep.mubr.bf16.mxu1 %v1605_v29  ;;  %v1611_v55 = vsel %vm1593_vm2, %v1601_v58, %v1610_v35 }
  0x74   : > { %2495 = vmatpush3.bf16.msra.mxu0 %v2662_v33  ;;  %v1607_v47 = vsel %vm1593_vm2, %v1595_v11, %v1606_v38 }
  0x75   : > { %2523 = vmatpush3.bf16.msra.mxu1 %v2663_v32  ;;  %2496 = vmatprep.subr.bf16.mxu0 %v2664_v48 }
  0x76   : > { %2524 = vmatprep.subr.bf16.mxu1 %v2665_v57 }
  0x78   : > { %2497 = vmatpush3.bf16.msra.mxu0 %v2666_v49 }
  0x79   : > { %2525 = vmatpush3.bf16.msra.mxu1 %v2667_v51  ;;  %2498 = vmatprep.subr.bf16.mxu0 %v2668_v52 }
  0x7a   : > { %2526 = vmatprep.subr.bf16.mxu1 %v2669_v53 }
  0x7c   : > { %2499 = vmatpush3.bf16.msra.mxu0 %v2670_v54 }
  0x7d   : > { %2527 = vmatpush3.bf16.msra.mxu1 %v2671_v59  ;;  %2500 = vmatprep.subr.bf16.mxu0 %v2672_v61 }
  0x7e   : > { %2528 = vmatprep.subr.bf16.mxu1 %v2673_v63 }
  0x80   : > { %2501 = vmatpush3.bf16.msra.mxu0 %v2674_v0 }
  0x81   : > { %2529 = vmatpush3.bf16.msra.mxu1 %v2675_v1  ;;  %2502 = vmatprep.subr.bf16.mxu0 %v2676_v2 }
  0x82   : > { %2530 = vmatprep.subr.bf16.mxu1 %v2677_v6 }
  0x84   : > { %2503 = vmatpush3.bf16.msra.mxu0 %v2678_v8 }
  0x85   : > { %2531 = vmatpush3.bf16.msra.mxu1 %v2679_v10 }
  0x87   : > { %1847 = vmatmul.mubr.bf16.vlgmr.msra.gmra.mrb[24].mxu0 %v1596_v30 }
  0x88   : > { %1896 = vmatmul.mubr.bf16.vlgmr.msra.gmra.mrb[24].mxu1 %v1602_v5  ;;  %1854 = vmatprep.mubr.bf16.mxu0 %v1609_v31 }
  0x89   : > { %1903 = vmatprep.mubr.bf16.mxu1 %v1613_v34 }
  0x8f   : > { %1855 = vmatmul.mubr.bf16.gmra.mrb[28].mxu0 %v1607_v47 }
  0x90   : > { %1904 = vmatmul.mubr.bf16.gmra.mrb[28].mxu1 %v1611_v55 }
  0xfa   : > { %v2336_v36 = vpop.f32.mrb[0].mxu0 }
  0xfb   : > { %v2337_v37 = vpop.f32.mrb[1].mxu0  ;;  %v2364_v40 = vpop.f32.mrb[0].mxu1 }
  0xfc   : > { %v2338_v41 = vadd.f32 %v2337_v37, %v2336_v36  ;;  %v2339_v42 = vpop.f32.mrb[2].mxu0  ;;  %v2365_v44 = vpop.f32.mrb[1].mxu1 }
  0xfd   : > { %v2340_v33 = vpop.f32.mrb[3].mxu0  ;;  %v2366_v32 = vadd.f32 %v2365_v44, %v2364_v40  ;;  %v2367_v48 = vpop.f32.mrb[2].mxu1 }
  0xfe   : > { %v2341_v57 = vadd.f32 %v2340_v33, %v2339_v42  ;;  %v2368_v49 = vpop.f32.mrb[3].mxu1 }
  0xff   : > { %v728_v51 = vadd.f32 %v2366_v32, %v2338_v41  ;;  %v2369_v52 = vadd.f32 %v2368_v49, %v2367_v48 }
 0x101   : > { %v731_v53 = vadd.f32 %v2369_v52, %v2341_v57 }
 0x102   : > { %v2342_v54 = vpop.f32.mrb[4].mxu0 }
 0x103   : > { %v2370_v59 = vpop.f32.mrb[4].mxu1  ;;  %v2343_v61 = vpop.f32.mrb[5].mxu0 }
 0x104   : > { %v2371_v63 = vpop.f32.mrb[5].mxu1  ;;  %v2344_v0 = vadd.f32 %v2343_v61, %v2342_v54  ;;  %v2345_v2 = vpop.f32.mrb[6].mxu0 }
 0x105   : > { %v2372_v1 = vadd.f32 %v2371_v63, %v2370_v59  ;;  %v2373_v6 = vpop.f32.mrb[6].mxu1  ;;  %v2346_v7 = vpop.f32.mrb[7].mxu0 }
 0x106   : > { %v2374_v8 = vpop.f32.mrb[7].mxu1  ;;  %v2347_v10 = vadd.f32 %v2346_v7, %v2345_v2 }
 0x107   : > { %v736_v9 = vadd.f32 %v2372_v1, %v2344_v0  ;;  %v2375_v11 = vadd.f32 %v2374_v8, %v2373_v6 }
 0x109   : > { %v739_v39 = vadd.f32 %v2375_v11, %v2347_v10 }
 0x11a   : > { %v2392_v62 = vpop.f32.mrb[8].mxu0 }
 0x11b   : > { %v2420_v12 = vpop.f32.mrb[8].mxu1  ;;  %v2393_v3 = vpop.f32.mrb[9].mxu0 }
 0x11c   : > { %v2421_v15 = vpop.f32.mrb[9].mxu1  ;;  %v2394_v46 = vadd.f32 %v2393_v3, %v2392_v62  ;;  %v2395_v17 = vpop.f32.mrb[10].mxu0 }
 0x11d   : > { %v2422_v16 = vadd.f32 %v2421_v15, %v2420_v12  ;;  %v2423_v4 = vpop.f32.mrb[10].mxu1  ;;  %v2396_v14 = vpop.f32.mrb[11].mxu0 }
 0x11e   : > { %v2424_v18 = vpop.f32.mrb[11].mxu1  ;;  %v969_v56 = vadd.f32 %v2394_v46, %v728_v51  ;;  %v2397_v19 = vadd.f32 %v2396_v14, %v2395_v17 }
 0x11f   : > { %v2425_v13 = vadd.f32 %v2424_v18, %v2423_v4 }
 0x120   : > { %v1018_v58 = vadd.f32 %v2422_v16, %v969_v56  ;;  %v972_v20 = vadd.f32 %v2397_v19, %v731_v53 }
 0x122   : > { %v1021_v43 = vadd.f32 %v2425_v13, %v972_v20  ;;  %v2398_v21 = vpop.f32.mrb[12].mxu0 }
 0x123   : > { %v2426_v50 = vpop.f32.mrb[12].mxu1  ;;  %v2399_v22 = vpop.f32.mrb[13].mxu0 }
 0x124   : > { %v2427_v23 = vpop.f32.mrb[13].mxu1  ;;  %v2400_v45 = vadd.f32 %v2399_v22, %v2398_v21  ;;  %v2401_v24 = vpop.f32.mrb[14].mxu0 }
 0x125   : > { %v2428_v25 = vadd.f32 %v2427_v23, %v2426_v50  ;;  %v2429_v26 = vpop.f32.mrb[14].mxu1  ;;  %v2402_v27 = vpop.f32.mrb[15].mxu0 }
 0x126   : > { %v2430_v28 = vpop.f32.mrb[15].mxu1  ;;  %v977_v60 = vadd.f32 %v2400_v45, %v736_v9  ;;  %v2403_v29 = vadd.f32 %v2402_v27, %v2401_v24 }
 0x127   : > { %v2431_v30 = vadd.f32 %v2430_v28, %v2429_v26 }
 0x128   : > { %v980_v5 = vadd.f32 %v2403_v29, %v739_v39  ;;  %v1026_v31 = vadd.f32 %v2428_v25, %v977_v60 }
 0x12a   : > { %v1029_v34 = vadd.f32 %v2431_v30, %v980_v5 }
 0x13a   : > { %v2448_v38 = vpop.f32.mrb[16].mxu0 }
 0x13b   : > { %v2476_v35 = vpop.f32.mrb[16].mxu1  ;;  %v2449_v47 = vpop.f32.mrb[17].mxu0 }
 0x13c   : > { %v2450_v55 = vadd.f32 %v2449_v47, %v2448_v38  ;;  %v2477_v36 = vpop.f32.mrb[17].mxu1  ;;  %v2451_v37 = vpop.f32.mrb[18].mxu0 }
 0x13d   : > { %v2478_v40 = vadd.f32 %v2477_v36, %v2476_v35  ;;  %v2479_v41 = vpop.f32.mrb[18].mxu1  ;;  %v2452_v42 = vpop.f32.mrb[19].mxu0 }
 0x13e   : > { %v2453_v44 = vadd.f32 %v2452_v42, %v2451_v37  ;;  %v2480_v33 = vpop.f32.mrb[19].mxu1 }
 0x13f   : > { %v1482_v32 = vadd.f32 %v2478_v40, %v2450_v55  ;;  %v2481_v48 = vadd.f32 %v2480_v33, %v2479_v41 }
 0x141   : > { %v1496_v57 = vadd.f32 %v1482_v32, %v1018_v58  ;;  %v1485_v49 = vadd.f32 %v2481_v48, %v2453_v44  ;;  %v2316_v58 = vld [vmem:[%s3300_s2] ss:$0 sm:$0xff] }
 0x142   : > { %v2454_v52 = vpop.f32.mrb[20].mxu0 }
 0x143   : > { %v1497_v51 = vadd.f32 %v1485_v49, %v1021_v43  ;;  %v2482_v53 = vpop.f32.mrb[20].mxu1  ;;  %v2455_v54 = vpop.f32.mrb[21].mxu0 }
 0x144   : > { %v2483_v59 = vpop.f32.mrb[21].mxu1  ;;  %v2456_v61 = vadd.f32 %v2455_v54, %v2454_v52  ;;  %v2457_v0 = vpop.f32.mrb[22].mxu0 }
 0x145   : > { %v2484_v63 = vadd.f32 %v2483_v59, %v2482_v53  ;;  %v2485_v1 = vpop.f32.mrb[22].mxu1  ;;  %v2458_v2 = vpop.f32.mrb[23].mxu0 }
 0x146   : > { %v2486_v6 = vpop.f32.mrb[23].mxu1  ;;  %v2459_v8 = vadd.f32 %v2458_v2, %v2457_v0 }
 0x147   : > { %v1490_v7 = vadd.f32 %v2484_v63, %v2456_v61  ;;  %v2487_v9 = vadd.f32 %v2486_v6, %v2485_v1 }
 0x149   : > { %v1498_v10 = vadd.f32 %v1490_v7, %v1026_v31  ;;  %v1493_v11 = vadd.f32 %v2487_v9, %v2459_v8 }
 0x14b   : > { %v1499_v39 = vadd.f32 %v1493_v11, %v1029_v34 }
 0x15a   : > { %v2504_v62 = vpop.f32.mrb[24].mxu0 }
 0x15b   : > { %v2532_v12 = vpop.f32.mrb[24].mxu1  ;;  %v2505_v3 = vpop.f32.mrb[25].mxu0 }
 0x15c   : > { %v2533_v15 = vpop.f32.mrb[25].mxu1  ;;  %v2506_v46 = vadd.f32 %v2505_v3, %v2504_v62  ;;  %v2507_v17 = vpop.f32.mrb[26].mxu0 }
 0x15d   : > { %v2534_v16 = vadd.f32 %v2533_v15, %v2532_v12  ;;  %v2535_v4 = vpop.f32.mrb[26].mxu1  ;;  %v2508_v14 = vpop.f32.mrb[27].mxu0 }
 0x15e   : > { %v2536_v18 = vpop.f32.mrb[27].mxu1  ;;  %v2509_v19 = vadd.f32 %v2508_v14, %v2507_v17 }
 0x15f   : > { %v1898_v56 = vadd.f32 %v2534_v16, %v2506_v46  ;;  %v2537_v13 = vadd.f32 %v2536_v18, %v2535_v4 }
 0x161   : > { %v1912_v20 = vadd.f32 %v1898_v56, %v1496_v57  ;;  %v1901_v43 = vadd.f32 %v2537_v13, %v2509_v19 }
 0x162   : > { %v2510_v22 = vpop.f32.mrb[28].mxu0 }
 0x163   : > { %v1923_v21 = vadd.f32 %v2316_v58, %v1912_v20  ;;  %v1913_v50 = vadd.f32 %v1901_v43, %v1497_v51  ;;  %v2538_v23 = vpop.f32.mrb[28].mxu1  ;;  %v2511_v45 = vpop.f32.mrb[29].mxu0 }
 0x164   : > { %v2539_v24 = vpop.f32.mrb[29].mxu1  ;;  %v2512_v26 = vadd.f32 %v2511_v45, %v2510_v22  ;;  %v2513_v28 = vpop.f32.mrb[30].mxu0 }
 0x165   : > { %1927 = vst [vmem:[%s175_s10] sm:$0xff] %v1923_v21  ;;  %v1924_v25 = vadd.f32 %v2316_v58, %v1913_v50  ;;  %v2540_v27 = vadd.f32 %v2539_v24, %v2538_v23  ;;  %v2541_v60 = vpop.f32.mrb[30].mxu1  ;;  %v2514_v29 = vpop.f32.mrb[31].mxu0 }
 0x166   : > { %v2542_v30 = vpop.f32.mrb[31].mxu1  ;;  %v2515_v31 = vadd.f32 %v2514_v29, %v2513_v28 }
 0x167   : > { %1928 = vst [vmem:[%s175_s10 + $0x8] sm:$0xff] %v1924_v25  ;;  %v1906_v5 = vadd.f32 %v2540_v27, %v2512_v26  ;;  %v2543_v34 = vadd.f32 %v2542_v30, %v2541_v60 }
 0x169   : > { %v1914_v38 = vadd.f32 %v1906_v5, %v1498_v10  ;;  %v1909_v35 = vadd.f32 %v2543_v34, %v2515_v31 }
 0x16b   : > { %v1925_v47 = vadd.f32 %v2316_v58, %v1914_v38  ;;  %v1915_v55 = vadd.f32 %v1909_v35, %v1499_v39 }
 0x16d   : > { %1929 = vst [vmem:[%s175_s10 + $0x10] sm:$0xff] %v1925_v47  ;;  %v1926_v36 = vadd.f32 %v2316_v58, %v1915_v55 }
 0x16f   : > { %1930 = vst [vmem:[%s175_s10 + $0x18] sm:$0xff] %v1926_v36 }
 0x170 PF: > { %s13_s12 = sadd.s32 1, %s2690_s12  }
 0x171   : > { %p10_p5 = scmp.ge.s32.totalorder %s13_s12, 4  }
 0x173   :  { %12 = sbr.rel (!%p10_p5) target bundleno = 1 (0x1), region = 65 }

// kernel: encoder_forward.6
= control target key start
LH: loop header
LB: loop body
LE: loop exit
PB: predicated region body
PF: predicated region fallthrough
CT: control target
= control target key end

     0   :  { %s2402_s18 = smov 0   ;;  %s2874_s0 = inlined_call_operand.vmem [shape: f32[112,128], index: 0, kind: input, shape index: {}]   ;;  %s2875_s1 = inlined_call_operand.vmem [shape: bf16[9,128,128], index: 1, kind: input, shape index: {}]   ;;  %s2876_s2 = inlined_call_operand.vmem [shape: f32[1,128], index: 2, kind: input, shape index: {}]   ;;  %s2877_s3 = inlined_call_operand.vmem [shape: bf16[128,128], index: 3, kind: input, shape index: {}]   ;;  %s2878_s4 = inlined_call_operand.vmem [shape: f32[1,128], index: 4, kind: input, shape index: {}]   ;;  %s2879_s5 = inlined_call_operand.vmem [shape: f32[80,128], index: 5, kind: output, shape index: {}]  }
   0x1 LB: > { %s1663_s19 = sadd.s32 4294967295, %s2368_s18   ;;  %p1667_p0 = scmp.ge.s32.totalorder %s2368_s18, 1  ;;  %s2368_s18 = sphi %s2402_s18, %s15_s18  }
   0x2   : > { %p188_p1 = scmp.lt.s32.totalorder %s2368_s18, 3 }
   0x4   : > { %p189_p2 = pnand %p1667_p0, %p188_p1 }
   0x5   : > { %v2282_v0 = vld [vmem:[%s2875_s1 + $0x40] sm:$0xff] (!%p189_p2)   ;;  %v2370_v1 = vmov (!%p189_p2), 0.0   ;;  %v2284_v3 = vld [vmem:[%s2875_s1 + $0x48] sm:$0xff] (!%p189_p2)   ;;  %vm2371_vm0 = vmmov (!%p189_p2), 0   ;;  %s216_s26 = smul.u32 (!%p189_p2), 7, %s1663_s19  ;;  %v2286_v5 = vld [vmem:[%s2875_s1 + $0x50] sm:$0xff] (!%p189_p2)  }
   0x6   : > { %192 = sbr.rel (%p189_p2) target bundleno = 621 (0x26d), region = 40  ;;  %1992 = vmatprep.subr.bf16.mxu0 (!%p189_p2), %v2370_v1  ;;  %2020 = vmatprep.subr.bf16.mxu1 (!%p189_p2), %v2370_v1  ;;  %v2283_v2 = vld [vmem:[%s2875_s1] sm:$0xff] (!%p189_p2)   ;;  %v2285_v4 = vld [vmem:[%s2875_s1 + $0x8] sm:$0xff] (!%p189_p2)   ;;  %v2287_v6 = vld [vmem:[%s2875_s1 + $0x10] sm:$0xff] (!%p189_p2)  }
   0x7   : > { %1993 = vmatpush3.bf16.msra.mxu0 (!%p189_p2), %v2282_v0  ;;  %2008 = vmatprep.mubr.msk.bf16.mxu0 (!%p189_p2), %vm2371_vm0, %v2370_v1  ;;  %p217_p3 = scmp.lt.s32.totalorder (!%p189_p2), %s216_s26, 13  ;;  %v2288_v7 = vld [vmem:[%s2875_s1 + $0x58] sm:$0xff] (!%p189_p2)   ;;  %v2290_v9 = vld [vmem:[%s2875_s1 + $0x60] sm:$0xff] (!%p189_p2)   ;;  %v2292_v14 = vld [vmem:[%s2875_s1 + $0x68] sm:$0xff] (!%p189_p2)   ;;  %s222_s7 = smul.u32 (!%p189_p2), 5, %s1663_s19 }
   0x8   : > { %2021 = vmatpush3.bf16.msra.mxu1 (!%p189_p2), %v2283_v2  ;;  %1994 = vmatprep.subr.bf16.mxu0 (!%p189_p2), %v2370_v1  ;;  %v2289_v8 = vld [vmem:[%s2875_s1 + $0x18] sm:$0xff] (!%p189_p2)   ;;  %v2291_v10 = vld [vmem:[%s2875_s1 + $0x20] sm:$0xff] (!%p189_p2)   ;;  %v2293_v18 = vld [vmem:[%s2875_s1 + $0x28] sm:$0xff] (!%p189_p2)  }
   0x9   : > { %2022 = vmatprep.subr.bf16.mxu1 (!%p189_p2), %v2370_v1  ;;  %2036 = vmatprep.mubr.msk.bf16.mxu1 (!%p189_p2), %vm2371_vm0, %v2370_v1  ;;  %v2294_v20 = vld [vmem:[%s2875_s1 + $0x70] sm:$0xff] (!%p189_p2)   ;;  %v2296_v22 = vld [vmem:[%s2875_s1 + $0x78] sm:$0xff] (!%p189_p2)   ;;  %v2298_v35 = vld [vmem:[%s2875_s1 + $0x80] sm:$0xff] (!%p189_p2)   ;;  %p223_p4 = scmp.lt.s32.totalorder (!%p189_p2), %s222_s7, 9 }
   0xa   : > { %v2295_v21 = vld [vmem:[%s2875_s1 + $0x30] sm:$0xff] (!%p189_p2)   ;;  %v2297_v27 = vld [vmem:[%s2875_s1 + $0x38] sm:$0xff] (!%p189_p2)   ;;  %v2299_v37 = vld [vmem:[%s2875_s1 + $0xc0] sm:$0xff] (!%p189_p2)  }
   0xb   : > { %1995 = vmatpush3.bf16.msra.mxu0 (!%p189_p2), %v2284_v3  ;;  %v2300_v39 = vld [vmem:[%s2875_s1 + $0x88] sm:$0xff] (!%p189_p2)   ;;  %v2302_v46 = vld [vmem:[%s2875_s1 + $0x90] sm:$0xff] (!%p189_p2)   ;;  %v2304_v49 = vld [vmem:[%s2875_s1 + $0x98] sm:$0xff] (!%p189_p2)  }
   0xc   : > { %2023 = vmatpush3.bf16.msra.mxu1 (!%p189_p2), %v2285_v4  ;;  %1996 = vmatprep.subr.bf16.mxu0 (!%p189_p2), %v2370_v1  ;;  %v2301_v40 = vld [vmem:[%s2875_s1 + $0xc8] sm:$0xff] (!%p189_p2)   ;;  %v2303_v48 = vld [vmem:[%s2875_s1 + $0xd0] sm:$0xff] (!%p189_p2)   ;;  %v2305_v51 = vld [vmem:[%s2875_s1 + $0xd8] sm:$0xff] (!%p189_p2)  }
   0xd   : > { %s2881_s26 = smov (!%p217_p3, %s216_s26), 13  ;;  %2024 = vmatprep.subr.bf16.mxu1 %v2370_v1  ;;  %v2306_v56 = vld [vmem:[%s2875_s1 + $0xa0] sm:$0xff]   ;;  %v2308_v60 = vld [vmem:[%s2875_s1 + $0xa8] sm:$0xff]   ;;  %v2310_v2 = vld [vmem:[%s2875_s1 + $0xb0] sm:$0xff]   ;;  %s2883_s7 = smov (!%p223_p4, %s222_s7), 9 }
   0xe   : > { %s1668_s10 = sshll.u32 %s2881_s26, 3  ;;  %v2307_v59 = vld [vmem:[%s2875_s1 + $0xe0] sm:$0xff]   ;;  %v2309_v63 = vld [vmem:[%s2875_s1 + $0xe8] sm:$0xff]   ;;  %v2311_v3 = vld [vmem:[%s2875_s1 + $0xf0] sm:$0xff]  }
   0xf   : > { %1997 = vmatpush3.bf16.msra.mxu0 %v2286_v5  ;;  %s2451_s15 = scalar_lea.vmem %s2874_s0, %s1668_s10  ;;  %v2312_v4 = vld [vmem:[%s2875_s1 + $0xb8] sm:$0xff]   ;;  %s1669_s10 = sshll.u32 %s2883_s7, 3 }
  0x10   : > { %2025 = vmatpush3.bf16.msra.mxu1 %v2287_v6  ;;  %1998 = vmatprep.subr.bf16.mxu0 %v2370_v1  ;;  %v229_v11 = vld [vmem:[%s2451_s15] sm:$0xff]  ;;  %v230_v12 = vld [vmem:[%s2451_s15 + $0x8] sm:$0xff]  ;;  %v231_v13 = vld [vmem:[%s2451_s15 + $0x10] sm:$0xff]  ;;  %s226_s13 = scalar_lea.vmem %s2879_s5, %s1669_s10 }
  0x11   : > { %2026 = vmatprep.subr.bf16.mxu1 %v2370_v1  ;;  %v236_v15 = vmax.f32 %v229_v11, 0.0  ;;  %v237_v16 = vmax.f32 %v230_v12, 0.0  ;;  %v238_v17 = vmax.f32 %v231_v13, 0.0  ;;  %v232_v23 = vld [vmem:[%s2451_s15 + $0x18] sm:$0xff]  ;;  %v233_v24 = vld [vmem:[%s2451_s15 + $0x20] sm:$0xff]  ;;  %v234_v36 = vld [vmem:[%s2451_s15 + $0x28] sm:$0xff] }
  0x12   : > { %v239_v25 = vmax.f32 %v232_v23, 0.0  ;;  %v240_v26 = vmax.f32 %v233_v24, 0.0  ;;  %v2505_v38 = vmax.f32 %v234_v36, 0.0  ;;  %v2313_v5 = vld [vmem:[%s2875_s1 + $0xf8] sm:$0xff]   ;;  %v2315_v12 = vld [vmem:[%s2875_s1 + $0x140] sm:$0xff]   ;;  %v2316_v13 = vld [vmem:[%s2875_s1 + $0x108] sm:$0xff]  }
  0x13   : > { %1999 = vmatpush3.bf16.msra.mxu0 %v2288_v7  ;;  %243 = vst [vmem:[#allocation2] sm:$0xff] %v236_v15  ;;  %244 = vst [vmem:[#allocation2 + $0x8] sm:$0xff] %v237_v16  ;;  %v2471_v19 = vpack.c.bf16 %v238_v17, %v237_v16  ;;  %v235_v16 = vld [vmem:[%s2451_s15 + $0x30] sm:$0xff]  ;;  %v2320_v24 = vld [vmem:[%s2875_s1 + $0x118] sm:$0xff]  }
  0x14   : > { %2027 = vmatpush3.bf16.msra.mxu1 %v2289_v8  ;;  %2000 = vmatprep.subr.bf16.mxu0 %v2370_v1  ;;  %245 = vst [vmem:[#allocation2 + $0x10] sm:$0xff] %v238_v17  ;;  %246 = vst [vmem:[#allocation2 + $0x18] sm:$0xff] %v239_v25  ;;  %v2493_v32 = vpack.c.bf16 %v240_v26, %v239_v25  ;;  %v2317_v17 = vld [vmem:[%s2875_s1 + $0x148] sm:$0xff]   ;;  %v2319_v23 = vld [vmem:[%s2875_s1 + $0x150] sm:$0xff]  }
  0x15   : > { %2028 = vmatprep.subr.bf16.mxu1 %v2370_v1  ;;  %247 = vst [vmem:[#allocation2 + $0x20] sm:$0xff] %v240_v26  ;;  %248 = vst [vmem:[#allocation2 + $0x28] sm:$0xff] %v2505_v38  ;;  %v2321_v26 = vld [vmem:[%s2875_s1 + $0x158] sm:$0xff]   ;;  %v2327_v36 = vld [vmem:[%s2875_s1 + $0x170] sm:$0xff]  }
  0x17   : > { %2001 = vmatpush3.bf16.msra.mxu0 %v2290_v9 }
  0x18   : > { %2029 = vmatpush3.bf16.msra.mxu1 %v2291_v10  ;;  %2002 = vmatprep.subr.bf16.mxu0 %v2370_v1  ;;  %v2314_v10 = vld [vmem:[%s2875_s1 + $0x100] sm:$0xff]  }
  0x19   : > { %2030 = vmatprep.subr.bf16.mxu1 %v2370_v1 }
  0x1a   : > { %v274_v28 = vld [vmem:[#allocation2 + $0x2] sm:$0xff] }
  0x1b   : > { %2003 = vmatpush3.bf16.msra.mxu0 %v2292_v14  ;;  %v275_v29 = vld [vmem:[#allocation2 + $0xa] sm:$0xff]  ;;  %v250_v30 = vld [vmem:[#allocation2 + $0x1] sm:$0xff]  ;;  %v276_v41 = vld [vmem:[#allocation2 + $0x12] sm:$0xff] }
  0x1c   : > { %2031 = vmatpush3.bf16.msra.mxu1 %v2293_v18  ;;  %2004 = vmatprep.subr.bf16.mxu0 %v2370_v1  ;;  %v2491_v31 = vld [vmem:[#allocation2 + $0x9] sm:$0xff]  ;;  %v279_v33 = vpack.c.bf16 %v275_v29, %v274_v28  ;;  %v277_v42 = vld [vmem:[#allocation2 + $0x1a] sm:$0xff]  ;;  %v2515_v43 = vld [vmem:[#allocation2 + $0x11] sm:$0xff]  ;;  %v242_v18 = vmax.f32 %v235_v16, 0.0 }
  0x1d   : > { %2032 = vmatprep.subr.bf16.mxu1 %v2370_v1  ;;  %v255_v34 = vpack.c.bf16 %v2491_v31, %v250_v30  ;;  %v2518_v44 = vld [vmem:[#allocation2 + $0x19] sm:$0xff]  ;;  %v280_v45 = vpack.c.bf16 %v277_v42, %v276_v41  ;;  %v278_v50 = vld [vmem:[#allocation2 + $0x22] sm:$0xff]  ;;  %v2549_v54 = vld [vmem:[#allocation2 + $0xf] sm:$0xff]  ;;  %v914_v41 = vpack.c.bf16 %v2515_v43, %v2491_v31 }
  0x1e   : > { %v256_v47 = vpack.c.bf16 %v2518_v44, %v2515_v43  ;;  %v2542_v52 = vld [vmem:[#allocation2 + $0x21] sm:$0xff]  ;;  %v281_v53 = vpack.c.bf16 %v278_v50, %v278_v50  ;;  %v2551_v55 = vld [vmem:[#allocation2 + $0x17] sm:$0xff]  ;;  %v508_v7 = vld [vmem:[#allocation2 + $0xb] sm:$0xff]  ;;  %249 = vst [vmem:[#allocation2 + $0x30] sm:$0xff] %v242_v18 }
  0x1f   : > { %2005 = vmatpush3.bf16.msra.mxu0 %v2294_v20  ;;  %v257_v57 = vpack.c.bf16 %v2542_v52, %v2542_v52  ;;  %v1316_v58 = vpack.c.bf16 %v2551_v55, %v2549_v54  ;;  %v2568_v61 = vld [vmem:[#allocation2 + $0x1f] sm:$0xff]  ;;  %v2570_v62 = vld [vmem:[#allocation2 + $0x27] sm:$0xff]  ;;  %v509_v14 = vld [vmem:[#allocation2 + $0x13] sm:$0xff]  ;;  %v915_v43 = vpack.c.bf16 %v2542_v52, %v2518_v44 }
  0x20   : > { %2033 = vmatpush3.bf16.msra.mxu1 %v2295_v21  ;;  %2006 = vmatprep.subr.bf16.mxu0 %v2370_v1  ;;  %v1317_v0 = vpack.c.bf16 %v2570_v62, %v2568_v61  ;;  %v507_v6 = vld [vmem:[#allocation2 + $0x3] sm:$0xff]  ;;  %v510_v15 = vld [vmem:[#allocation2 + $0x1b] sm:$0xff]  ;;  %v2318_v21 = vld [vmem:[%s2875_s1 + $0x110] sm:$0xff]   ;;  %v648_v29 = vpack.c.bf16 %v2570_v62, %v2570_v62 }
  0x21   : > { %2034 = vmatprep.subr.bf16.mxu1 %v2370_v1  ;;  %v641_v8 = vld [vmem:[#allocation2 + $0x7] sm:$0xff]  ;;  %v512_v9 = vpack.c.bf16 %v508_v7, %v507_v6  ;;  %v513_v20 = vpack.c.bf16 %v510_v15, %v509_v14  ;;  %v2337_v44 = vld [vmem:[%s2875_s1 + $0x1d8] sm:$0xff]  }
  0x22   : > { %v646_v11 = vpack.c.bf16 %v2549_v54, %v641_v8  ;;  %v511_v25 = vld [vmem:[#allocation2 + $0x23] sm:$0xff]  ;;  %v2349_v15 = vld [vmem:[%s2875_s1 + $0x218] sm:$0xff]  }
  0x23   : > { %2007 = vmatpush3.bf16.msra.mxu0 %v2296_v22  ;;  %v647_v22 = vpack.c.bf16 %v2568_v61, %v2551_v55  ;;  %v2322_v28 = vld [vmem:[%s2875_s1 + $0x120] sm:$0xff]   ;;  %v2333_v31 = vld [vmem:[%s2875_s1 + $0x1c8] sm:$0xff]   ;;  %v2356_v55 = vld [vmem:[%s2877_s3 + $0x10] sm:$0xff]  }
  0x24   : > { %2035 = vmatpush3.bf16.msra.mxu1 %v2297_v27  ;;  %2048 = vmatprep.subr.bf16.mxu0 %v2370_v1  ;;  %v514_v27 = vpack.c.bf16 %v511_v25, %v511_v25  ;;  %v2323_v30 = vld [vmem:[%s2875_s1 + $0x160] sm:$0xff]   ;;  %v2341_v52 = vld [vmem:[%s2875_s1 + $0x1e8] sm:$0xff]  }
  0x25   : > { %2076 = vmatprep.subr.bf16.mxu1 %v2370_v1  ;;  %v2331_v42 = vld [vmem:[%s2875_s1 + $0x1c0] sm:$0xff]   ;;  %v2347_v7 = vld [vmem:[%s2875_s1 + $0x208] sm:$0xff]  }
  0x26   : > { %2009 = vmatmul.mubr.bf16.vlgmr.msra.gmra.mrb[0].mxu0 %v279_v33  ;;  %v2324_v33 = vld [vmem:[%s2875_s1 + $0x128] sm:$0xff]   ;;  %v1045_v8 = vld [vmem:[#allocation2 + $0x1d] sm:$0xff] }
  0x27   : > { %2037 = vmatmul.mubr.bf16.vlgmr.msra.gmra.mrb[0].mxu1 %v255_v34  ;;  %2049 = vmatpush3.bf16.msra.mxu0 %v2298_v35  ;;  %v2325_v34 = vld [vmem:[%s2875_s1 + $0x168] sm:$0xff]   ;;  %v2326_v35 = vld [vmem:[%s2875_s1 + $0x130] sm:$0xff]   ;;  %v2358_v61 = vld [vmem:[%s2877_s3 + $0x20] sm:$0xff]  }
  0x28   : > { %2077 = vmatpush3.bf16.msra.mxu1 %v2299_v37  ;;  %2050 = vmatprep.subr.bf16.mxu0 %v2370_v1  ;;  %v2328_v37 = vld [vmem:[%s2875_s1 + $0x138] sm:$0xff]   ;;  %v1047_v16 = vld [vmem:[#allocation2 + $0x2d] sm:$0xff] }
  0x29   : > { %2078 = vmatprep.subr.bf16.mxu1 %v2370_v1  ;;  %2012 = vmatprep.mubr.msk.bf16.mxu0 %vm2371_vm0, %v2370_v1  ;;  %v1050_v18 = vpack.c.bf16 %v1047_v16, %v1047_v16  ;;  %v1315_v25 = vld [vmem:[#allocation2 + $0x2f] sm:$0xff] }
  0x2a   : > { %2040 = vmatprep.mubr.msk.bf16.mxu1 %vm2371_vm0, %v2370_v1  ;;  %v2355_v54 = vld [vmem:[%s2877_s3 + $0x8] sm:$0xff]  }
  0x2b   : > { %2051 = vmatpush3.bf16.msra.mxu0 %v2300_v39  ;;  %v2329_v39 = vld [vmem:[%s2875_s1 + $0x178] sm:$0xff]   ;;  %v2359_v62 = vld [vmem:[%s2877_s3 + $0x28] sm:$0xff]  }
  0x2c   : > { %2079 = vmatpush3.bf16.msra.mxu1 %v2301_v40  ;;  %2052 = vmatprep.subr.bf16.mxu0 %v2370_v1  ;;  %v2330_v40 = vld [vmem:[%s2875_s1 + $0x180] sm:$0xff]  }
  0x2d   : > { %2080 = vmatprep.subr.bf16.mxu1 %v2370_v1 }
  0x2e   : > { %2013 = vmatmul.mubr.bf16.gmra.mrb[4].mxu0 %v280_v45  ;;  %v2332_v45 = vld [vmem:[%s2875_s1 + $0x188] sm:$0xff]  }
  0x2f   : > { %2053 = vmatpush3.bf16.msra.mxu0 %v2302_v46  ;;  %2041 = vmatmul.mubr.bf16.gmra.mrb[4].mxu1 %v256_v47  ;;  %v2335_v46 = vld [vmem:[%s2875_s1 + $0x1d0] sm:$0xff]   ;;  %v2336_v47 = vld [vmem:[%s2875_s1 + $0x198] sm:$0xff]  }
  0x30   : > { %2081 = vmatpush3.bf16.msra.mxu1 %v2303_v48  ;;  %2054 = vmatprep.subr.bf16.mxu0 %v2370_v1  ;;  %v913_v48 = vld [vmem:[#allocation2 + $0x29] sm:$0xff] }
  0x31   : > { %2082 = vmatprep.subr.bf16.mxu1 %v2370_v1  ;;  %2016 = vmatprep.mubr.msk.bf16.mxu0 %vm2371_vm0, %v2370_v1  ;;  %v916_v50 = vpack.c.bf16 %v913_v48, %v913_v48 }
  0x32   : > { %2044 = vmatprep.mubr.msk.bf16.mxu1 %vm2371_vm0, %v2370_v1 }
  0x33   : > { %2055 = vmatpush3.bf16.msra.mxu0 %v2304_v49  ;;  %v2338_v49 = vld [vmem:[%s2875_s1 + $0x1a0] sm:$0xff]  }
  0x34   : > { %2083 = vmatpush3.bf16.msra.mxu1 %v2305_v51  ;;  %2056 = vmatprep.subr.bf16.mxu0 %v2370_v1  ;;  %v2339_v51 = vld [vmem:[%s2875_s1 + $0x1e0] sm:$0xff]  }
  0x35   : > { %2084 = vmatprep.subr.bf16.mxu1 %v2370_v1 }
  0x36   : > { %2017 = vmatmul.mubr.bf16.gmra.mrb[8].mxu0 %v281_v53  ;;  %v2342_v53 = vld [vmem:[%s2875_s1 + $0x1b0] sm:$0xff]  }
  0x37   : > { %2057 = vmatpush3.bf16.msra.mxu0 %v2306_v56  ;;  %2045 = vmatmul.mubr.bf16.gmra.mrb[8].mxu1 %v257_v57  ;;  %v2343_v56 = vld [vmem:[%s2875_s1 + $0x1f0] sm:$0xff]   ;;  %v2344_v57 = vld [vmem:[%s2875_s1 + $0x1b8] sm:$0xff]  }
  0x38   : > { %2085 = vmatpush3.bf16.msra.mxu1 %v2307_v59  ;;  %2058 = vmatprep.subr.bf16.mxu0 %v2370_v1  ;;  %v1043_v59 = vld [vmem:[#allocation2 + $0xd] sm:$0xff] }
  0x39   : > { %2086 = vmatprep.subr.bf16.mxu1 %v2370_v1  ;;  %2064 = vmatprep.mubr.msk.bf16.mxu0 %vm2371_vm0, %v2370_v1 }
  0x3a   : > { %2092 = vmatprep.mubr.msk.bf16.mxu1 %vm2371_vm0, %v2370_v1 }
  0x3b   : > { %2059 = vmatpush3.bf16.msra.mxu0 %v2308_v60  ;;  %v1044_v60 = vld [vmem:[#allocation2 + $0x15] sm:$0xff] }
  0x3c   : > { %2087 = vmatpush3.bf16.msra.mxu1 %v2309_v63  ;;  %2060 = vmatprep.subr.bf16.mxu0 %v2370_v1  ;;  %v2345_v63 = vld [vmem:[%s2875_s1 + $0x1f8] sm:$0xff]  }
  0x3d   : > { %2088 = vmatprep.subr.bf16.mxu1 %v2370_v1 }
  0x3f   : > { %2061 = vmatpush3.bf16.msra.mxu0 %v2310_v2  ;;  %v1177_v2 = vld [vmem:[#allocation2 + $0xe] sm:$0xff] }
  0x40   : > { %2089 = vmatpush3.bf16.msra.mxu1 %v2311_v3  ;;  %2062 = vmatprep.subr.bf16.mxu0 %v2370_v1  ;;  %v1178_v3 = vld [vmem:[#allocation2 + $0x16] sm:$0xff] }
  0x41   : > { %2090 = vmatprep.subr.bf16.mxu1 %v2370_v1  ;;  %v1182_v6 = vpack.c.bf16 %v1178_v3, %v1177_v2 }
  0x43   : > { %2063 = vmatpush3.bf16.msra.mxu0 %v2312_v4  ;;  %v1048_v4 = vpack.c.bf16 %v1044_v60, %v1043_v59 }
  0x44   : > { %2091 = vmatpush3.bf16.msra.mxu1 %v2313_v5  ;;  %2104 = vmatprep.subr.bf16.mxu0 %v2370_v1  ;;  %v2346_v5 = vld [vmem:[%s2875_s1 + $0x200] sm:$0xff]  }
  0x45   : > { %2132 = vmatprep.subr.bf16.mxu1 %v2370_v1 }
  0x46   : > { %2065 = vmatmul.mubr.bf16.vlgmr.msra.gmra.mrb[12].mxu0 %v512_v9  ;;  %v1046_v9 = vld [vmem:[#allocation2 + $0x25] sm:$0xff] }
  0x47   : > { %2105 = vmatpush3.bf16.msra.mxu0 %v2314_v10  ;;  %2093 = vmatmul.mubr.bf16.vlgmr.msra.gmra.mrb[12].mxu1 %v646_v11  ;;  %v1179_v10 = vld [vmem:[#allocation2 + $0x1e] sm:$0xff]  ;;  %v1180_v11 = vld [vmem:[#allocation2 + $0x26] sm:$0xff] }
  0x48   : > { %2133 = vmatpush3.bf16.msra.mxu1 %v2315_v12  ;;  %2106 = vmatprep.subr.bf16.mxu0 %v2370_v1  ;;  %v1049_v12 = vpack.c.bf16 %v1046_v9, %v1045_v8  ;;  %v1183_v14 = vpack.c.bf16 %v1180_v11, %v1179_v10 }
  0x49   : > { %2134 = vmatprep.subr.bf16.mxu1 %v2370_v1  ;;  %2068 = vmatprep.mubr.msk.bf16.mxu0 %vm2371_vm0, %v2370_v1 }
  0x4a   : > { %2096 = vmatprep.mubr.msk.bf16.mxu1 %vm2371_vm0, %v2370_v1 }
  0x4b   : > { %2107 = vmatpush3.bf16.msra.mxu0 %v2316_v13  ;;  %v2348_v13 = vld [vmem:[%s2875_s1 + $0x210] sm:$0xff]  }
  0x4c   : > { %2135 = vmatpush3.bf16.msra.mxu1 %v2317_v17  ;;  %2108 = vmatprep.subr.bf16.mxu0 %v2370_v1  ;;  %v1181_v17 = vld [vmem:[#allocation2 + $0x2e] sm:$0xff] }
  0x4d   : > { %2136 = vmatprep.subr.bf16.mxu1 %v2370_v1 }
  0x4e   : > { %2069 = vmatmul.mubr.bf16.gmra.mrb[16].mxu0 %v513_v20  ;;  %v2350_v20 = vld [vmem:[%s2875_s1 + $0x220] sm:$0xff]  }
  0x4f   : > { %2109 = vmatpush3.bf16.msra.mxu0 %v2318_v21  ;;  %2097 = vmatmul.mubr.bf16.gmra.mrb[16].mxu1 %v647_v22  ;;  %v1184_v21 = vpack.c.bf16 %v1181_v17, %v1181_v17  ;;  %v2351_v22 = vld [vmem:[%s2875_s1 + $0x228] sm:$0xff]  }
  0x50   : > { %2137 = vmatpush3.bf16.msra.mxu1 %v2319_v23  ;;  %2110 = vmatprep.subr.bf16.mxu0 %v2370_v1  ;;  %v2352_v23 = vld [vmem:[%s2875_s1 + $0x230] sm:$0xff]  }
  0x51   : > { %2138 = vmatprep.subr.bf16.mxu1 %v2370_v1  ;;  %2072 = vmatprep.mubr.msk.bf16.mxu0 %vm2371_vm0, %v2370_v1 }
  0x52   : > { %2100 = vmatprep.mubr.msk.bf16.mxu1 %vm2371_vm0, %v2370_v1 }
  0x53   : > { %2111 = vmatpush3.bf16.msra.mxu0 %v2320_v24  ;;  %v2353_v24 = vld [vmem:[%s2875_s1 + $0x238] sm:$0xff]  }
  0x54   : > { %2139 = vmatpush3.bf16.msra.mxu1 %v2321_v26  ;;  %2112 = vmatprep.subr.bf16.mxu0 %v2370_v1  ;;  %v1318_v26 = vpack.c.bf16 %v1315_v25, %v1315_v25 }
  0x55   : > { %2140 = vmatprep.subr.bf16.mxu1 %v2370_v1 }
  0x56   : > { %2073 = vmatmul.mubr.bf16.gmra.mrb[20].mxu0 %v514_v27  ;;  %v2354_v27 = vld [vmem:[%s2877_s3] sm:$0xff]  }
  0x57   : > { %2113 = vmatpush3.bf16.msra.mxu0 %v2322_v28  ;;  %2101 = vmatmul.mubr.bf16.gmra.mrb[20].mxu1 %v648_v29 }
  0x58   : > { %2141 = vmatpush3.bf16.msra.mxu1 %v2323_v30  ;;  %2114 = vmatprep.subr.bf16.mxu0 %v2370_v1 }
  0x59   : > { %2142 = vmatprep.subr.bf16.mxu1 %v2370_v1  ;;  %2120 = vmatprep.mubr.msk.bf16.mxu0 %vm2371_vm0, %v2370_v1 }
  0x5a   : > { %2148 = vmatprep.mubr.msk.bf16.mxu1 %vm2371_vm0, %v2370_v1 }
  0x5b   : > { %2115 = vmatpush3.bf16.msra.mxu0 %v2324_v33 }
  0x5c   : > { %2143 = vmatpush3.bf16.msra.mxu1 %v2325_v34  ;;  %2116 = vmatprep.subr.bf16.mxu0 %v2370_v1 }
  0x5d   : > { %2144 = vmatprep.subr.bf16.mxu1 %v2370_v1 }
  0x5f   : > { %2117 = vmatpush3.bf16.msra.mxu0 %v2326_v35 }
  0x60   : > { %2145 = vmatpush3.bf16.msra.mxu1 %v2327_v36  ;;  %2118 = vmatprep.subr.bf16.mxu0 %v2370_v1 }
  0x61   : > { %2146 = vmatprep.subr.bf16.mxu1 %v2370_v1 }
  0x63   : > { %2119 = vmatpush3.bf16.msra.mxu0 %v2328_v37  ;;  %v2360_v37 = vld [vmem:[%s2877_s3 + $0x30] sm:$0xff]  }
  0x64   : > { %2147 = vmatpush3.bf16.msra.mxu1 %v2329_v39  ;;  %2160 = vmatprep.subr.bf16.mxu0 %v2370_v1 }
  0x65   : > { %2188 = vmatprep.subr.bf16.mxu1 %v2370_v1 }
  0x66   : > { %2121 = vmatmul.mubr.bf16.vlgmr.msra.gmra.mrb[24].mxu0 %v2471_v19  ;;  %v2334_v19 = vld [vmem:[%s2875_s1 + $0x190] sm:$0xff]  }
  0x67   : > { %2161 = vmatpush3.bf16.msra.mxu0 %v2330_v40  ;;  %2149 = vmatmul.mubr.bf16.vlgmr.msra.gmra.mrb[24].mxu1 %v914_v41  ;;  %v2361_v41 = vld [vmem:[%s2877_s3 + $0x38] sm:$0xff]  }
  0x68   : > { %2189 = vmatpush3.bf16.msra.mxu1 %v2331_v42  ;;  %2162 = vmatprep.subr.bf16.mxu0 %v2370_v1 }
  0x69   : > { %2190 = vmatprep.subr.bf16.mxu1 %v2370_v1  ;;  %2124 = vmatprep.mubr.msk.bf16.mxu0 %vm2371_vm0, %v2370_v1 }
  0x6a   : > { %2152 = vmatprep.mubr.msk.bf16.mxu1 %vm2371_vm0, %v2370_v1 }
  0x6b   : > { %2163 = vmatpush3.bf16.msra.mxu0 %v2332_v45 }
  0x6c   : > { %2191 = vmatpush3.bf16.msra.mxu1 %v2333_v31  ;;  %2164 = vmatprep.subr.bf16.mxu0 %v2370_v1 }
  0x6d   : > { %2192 = vmatprep.subr.bf16.mxu1 %v2370_v1 }
  0x6e   : > { %2125 = vmatmul.mubr.bf16.gmra.mrb[28].mxu0 %v2493_v32  ;;  %v782_v32 = vpack.c.bf16 %v2505_v38, %v2505_v38  ;;  %v2340_v38 = vld [vmem:[%s2875_s1 + $0x1a8] sm:$0xff]  }
  0x6f   : > { %2165 = vmatpush3.bf16.msra.mxu0 %v2334_v19  ;;  %2153 = vmatmul.mubr.bf16.gmra.mrb[28].mxu1 %v915_v43 }
  0x70   : > { %2193 = vmatpush3.bf16.msra.mxu1 %v2335_v46  ;;  %2166 = vmatprep.subr.bf16.mxu0 %v2370_v1 }
  0x71   : > { %2194 = vmatprep.subr.bf16.mxu1 %v2370_v1  ;;  %2128 = vmatprep.mubr.msk.bf16.mxu0 %vm2371_vm0, %v2370_v1 }
  0x72   : > { %2156 = vmatprep.mubr.msk.bf16.mxu1 %vm2371_vm0, %v2370_v1 }
  0x73   : > { %2167 = vmatpush3.bf16.msra.mxu0 %v2336_v47 }
  0x74   : > { %2195 = vmatpush3.bf16.msra.mxu1 %v2337_v44  ;;  %2168 = vmatprep.subr.bf16.mxu0 %v2370_v1 }
  0x75   : > { %2196 = vmatprep.subr.bf16.mxu1 %v2370_v1 }
  0x76   : > { %2129 = vmatmul.mubr.bf16.gmra.mrb[32].mxu0 %v782_v32 }
  0x77   : > { %2169 = vmatpush3.bf16.msra.mxu0 %v2338_v49  ;;  %2157 = vmatmul.mubr.bf16.gmra.mrb[32].mxu1 %v916_v50 }
  0x78   : > { %2197 = vmatpush3.bf16.msra.mxu1 %v2339_v51  ;;  %2170 = vmatprep.subr.bf16.mxu0 %v2370_v1 }
  0x79   : > { %2198 = vmatprep.subr.bf16.mxu1 %v2370_v1  ;;  %2176 = vmatprep.mubr.msk.bf16.mxu0 %vm2371_vm0, %v2370_v1 }
  0x7a   : > { %2204 = vmatprep.mubr.msk.bf16.mxu1 %vm2371_vm0, %v2370_v1 }
  0x7b   : > { %2171 = vmatpush3.bf16.msra.mxu0 %v2340_v38 }
  0x7c   : > { %2199 = vmatpush3.bf16.msra.mxu1 %v2341_v52  ;;  %2172 = vmatprep.subr.bf16.mxu0 %v2370_v1 }
  0x7d   : > { %2200 = vmatprep.subr.bf16.mxu1 %v2370_v1 }
  0x7f   : > { %2173 = vmatpush3.bf16.msra.mxu0 %v2342_v53 }
  0x80   : > { %2201 = vmatpush3.bf16.msra.mxu1 %v2343_v56  ;;  %2174 = vmatprep.subr.bf16.mxu0 %v2370_v1 }
  0x81   : > { %2202 = vmatprep.subr.bf16.mxu1 %v2370_v1 }
  0x83   : > { %2175 = vmatpush3.bf16.msra.mxu0 %v2344_v57 }
  0x84   : > { %2203 = vmatpush3.bf16.msra.mxu1 %v2345_v63  ;;  %2216 = vmatprep.subr.bf16.mxu0 %v2370_v1 }
  0x85   : > { %2244 = vmatprep.subr.bf16.mxu1 %v2370_v1 }
  0x86   : > { %2177 = vmatmul.mubr.bf16.vlgmr.msra.gmra.mrb[36].mxu0 %v1048_v4 }
  0x87   : > { %2217 = vmatpush3.bf16.msra.mxu0 %v2346_v5  ;;  %2205 = vmatmul.mubr.bf16.vlgmr.msra.gmra.mrb[36].mxu1 %v1182_v6 }
  0x88   : > { %2218 = vmatprep.subr.bf16.mxu0 %v2370_v1  ;;  %2180 = vmatprep.mubr.msk.bf16.mxu0 %vm2371_vm0, %v2370_v1 }
  0x89   : > { %2208 = vmatprep.mubr.msk.bf16.mxu1 %vm2371_vm0, %v2370_v1  ;;  %2245 = vmatpush3.bf16.msra.mxu1 %v2354_v27 }
  0x8a   : > { %2246 = vmatprep.subr.bf16.mxu1 %v2370_v1 }
  0x8b   : > { %2219 = vmatpush3.bf16.msra.mxu0 %v2347_v7 }
  0x8c   : > { %2220 = vmatprep.subr.bf16.mxu0 %v2370_v1 }
  0x8d   : > { %2247 = vmatpush3.bf16.msra.mxu1 %v2355_v54 }
  0x8e   : > { %2181 = vmatmul.mubr.bf16.gmra.mrb[40].mxu0 %v1049_v12  ;;  %2248 = vmatprep.subr.bf16.mxu1 %v2370_v1 }
  0x8f   : > { %2221 = vmatpush3.bf16.msra.mxu0 %v2348_v13  ;;  %2209 = vmatmul.mubr.bf16.gmra.mrb[40].mxu1 %v1183_v14 }
  0x90   : > { %2222 = vmatprep.subr.bf16.mxu0 %v2370_v1  ;;  %2184 = vmatprep.mubr.msk.bf16.mxu0 %vm2371_vm0, %v2370_v1 }
  0x91   : > { %2212 = vmatprep.mubr.msk.bf16.mxu1 %vm2371_vm0, %v2370_v1  ;;  %2249 = vmatpush3.bf16.msra.mxu1 %v2356_v55 }
  0x92   : > { %2250 = vmatprep.subr.bf16.mxu1 %v2370_v1 }
  0x93   : > { %2223 = vmatpush3.bf16.msra.mxu0 %v2349_v15 }
  0x94   : > { %2224 = vmatprep.subr.bf16.mxu0 %v2370_v1 }
  0x96   : > { %2185 = vmatmul.mubr.bf16.gmra.mrb[44].mxu0 %v1050_v18 }
  0x97   : > { %2225 = vmatpush3.bf16.msra.mxu0 %v2350_v20  ;;  %2213 = vmatmul.mubr.bf16.gmra.mrb[44].mxu1 %v1184_v21 }
  0x98   : > { %2226 = vmatprep.subr.bf16.mxu0 %v2370_v1  ;;  %2232 = vmatprep.mubr.msk.bf16.mxu0 %vm2371_vm0, %v2370_v1 }
  0x99   : > { %2260 = vmatprep.mubr.msk.bf16.mxu1 %vm2371_vm0, %v2370_v1 }
  0x9b   : > { %2227 = vmatpush3.bf16.msra.mxu0 %v2351_v22 }
  0x9c   : > { %2228 = vmatprep.subr.bf16.mxu0 %v2370_v1 }
  0x9f   : > { %2229 = vmatpush3.bf16.msra.mxu0 %v2352_v23 }
  0xa0   : > { %2230 = vmatprep.subr.bf16.mxu0 %v2370_v1 }
  0xa3   : > { %2231 = vmatpush3.bf16.msra.mxu0 %v2353_v24 }
  0xa6   : > { %2233 = vmatmul.mubr.bf16.vlgmr.msra.gmra.mrb[48].mxu0 %v1316_v58  ;;  %v2357_v58 = vld [vmem:[%s2877_s3 + $0x18] sm:$0xff]  }
  0xa7   : > { %2236 = vmatprep.mubr.msk.bf16.mxu0 %vm2371_vm0, %v2370_v1  ;;  %2251 = vmatpush3.bf16.msra.mxu1 %v2357_v58 }
  0xa8   : > { %2252 = vmatprep.subr.bf16.mxu1 %v2370_v1 }
  0xab   : > { %2253 = vmatpush3.bf16.msra.mxu1 %v2358_v61 }
  0xac   : > { %2254 = vmatprep.subr.bf16.mxu1 %v2370_v1 }
  0xae   : > { %2237 = vmatmul.mubr.bf16.gmra.mrb[52].mxu0 %v1317_v0 }
  0xaf   : > { %2240 = vmatprep.mubr.msk.bf16.mxu0 %vm2371_vm0, %v2370_v1  ;;  %2255 = vmatpush3.bf16.msra.mxu1 %v2359_v62 }
  0xb0   : > { %2256 = vmatprep.subr.bf16.mxu1 %v2370_v1 }
  0xb3   : > { %2257 = vmatpush3.bf16.msra.mxu1 %v2360_v37 }
  0xb4   : > { %2258 = vmatprep.subr.bf16.mxu1 %v2370_v1 }
  0xb6   : > { %2241 = vmatmul.mubr.bf16.gmra.mrb[56].mxu0 %v1318_v26 }
  0xb7   : > { %2259 = vmatpush3.bf16.msra.mxu1 %v2361_v41 }
  0xf9   : > { %v381_v0 = vpop.f32.mrb[0].mxu0 }
  0xfa   : > { %v485_v28 = vpop.f32.mrb[0].mxu1  ;;  %v2010_v29 = vpop.f32.mrb[1].mxu0 }
  0xfb   : > { %v486_v30 = vadd.f32 %v485_v28, %v381_v0  ;;  %v2038_v33 = vpop.f32.mrb[1].mxu1  ;;  %v384_v34 = vpop.f32.mrb[2].mxu0 }
  0xfc   : > { %v488_v35 = vpop.f32.mrb[2].mxu1  ;;  %v2011_v36 = vpop.f32.mrb[3].mxu0 }
  0xfd   : > { %v489_v39 = vadd.f32 %v488_v35, %v384_v34  ;;  %v2039_v40 = vpop.f32.mrb[3].mxu1 }
 0x101   : > { %v389_v42 = vpop.f32.mrb[4].mxu0 }
 0x102   : > { %v2014_v45 = vpop.f32.mrb[5].mxu0  ;;  %v493_v31 = vpop.f32.mrb[4].mxu1 }
 0x103   : > { %v494_v19 = vadd.f32 %v493_v31, %v389_v42  ;;  %v392_v43 = vpop.f32.mrb[6].mxu0  ;;  %v2042_v46 = vpop.f32.mrb[5].mxu1 }
 0x104   : > { %v2015_v47 = vpop.f32.mrb[7].mxu0  ;;  %v496_v44 = vpop.f32.mrb[6].mxu1 }
 0x105   : > { %v497_v48 = vadd.f32 %v496_v44, %v392_v43  ;;  %v2043_v32 = vpop.f32.mrb[7].mxu1 }
 0x109   : > { %v397_v49 = vpop.f32.mrb[8].mxu0 }
 0x10a   : > { %v2018_v50 = vpop.f32.mrb[9].mxu0  ;;  %v501_v51 = vpop.f32.mrb[8].mxu1 }
 0x10b   : > { %v400_v38 = vpop.f32.mrb[10].mxu0  ;;  %v502_v52 = vadd.f32 %v501_v51, %v397_v49  ;;  %v2046_v53 = vpop.f32.mrb[9].mxu1 }
 0x10c   : > { %v2019_v56 = vpop.f32.mrb[11].mxu0  ;;  %v504_v57 = vpop.f32.mrb[10].mxu1 }
 0x10d   : > { %v2047_v59 = vpop.f32.mrb[11].mxu1 }
 0x119   : > { %v614_v60 = vpop.f32.mrb[12].mxu0 }
 0x11a   : > { %v636_v63 = vadd.f32 %v614_v60, %v486_v30  ;;  %v2066_v2 = vpop.f32.mrb[13].mxu0  ;;  %v748_v3 = vpop.f32.mrb[12].mxu1 }
 0x11b   : > { %v617_v4 = vpop.f32.mrb[14].mxu0  ;;  %v2094_v5 = vpop.f32.mrb[13].mxu1 }
 0x11c   : > { %v637_v6 = vadd.f32 %v617_v4, %v489_v39  ;;  %v770_v7 = vadd.f32 %v748_v3, %v636_v63  ;;  %v2067_v8 = vpop.f32.mrb[15].mxu0  ;;  %v751_v9 = vpop.f32.mrb[14].mxu1 }
 0x11d   : > { %v2095_v10 = vpop.f32.mrb[15].mxu1 }
 0x11e   : > { %v771_v11 = vadd.f32 %v751_v9, %v637_v6 }
 0x121   : > { %v622_v12 = vpop.f32.mrb[16].mxu0 }
 0x122   : > { %v638_v13 = vadd.f32 %v622_v12, %v494_v19  ;;  %v2070_v14 = vpop.f32.mrb[17].mxu0  ;;  %v756_v15 = vpop.f32.mrb[16].mxu1 }
 0x123   : > { %v625_v16 = vpop.f32.mrb[18].mxu0  ;;  %v2098_v17 = vpop.f32.mrb[17].mxu1 }
 0x124   : > { %v639_v18 = vadd.f32 %v625_v16, %v497_v48  ;;  %v772_v20 = vadd.f32 %v756_v15, %v638_v13  ;;  %v759_v21 = vpop.f32.mrb[18].mxu1  ;;  %v2071_v22 = vpop.f32.mrb[19].mxu0 }
 0x125   : > { %v2099_v23 = vpop.f32.mrb[19].mxu1 }
 0x126   : > { %v773_v24 = vadd.f32 %v759_v21, %v639_v18 }
 0x129   : > { %v630_v25 = vpop.f32.mrb[20].mxu0 }
 0x12a   : > { %v640_v26 = vadd.f32 %v630_v25, %v502_v52  ;;  %v764_v27 = vpop.f32.mrb[20].mxu1  ;;  %v2074_v54 = vpop.f32.mrb[21].mxu0 }
 0x12b   : > { %v633_v55 = vpop.f32.mrb[22].mxu0  ;;  %v2102_v58 = vpop.f32.mrb[21].mxu1 }
 0x12c   : > { %v774_v61 = vadd.f32 %v764_v27, %v640_v26  ;;  %v2075_v62 = vpop.f32.mrb[23].mxu0  ;;  %v767_v0 = vpop.f32.mrb[22].mxu1 }
 0x12d   : > { %v2103_v28 = vpop.f32.mrb[23].mxu1 }
 0x139   : > { %v882_v29 = vpop.f32.mrb[24].mxu0 }
 0x13a   : > { %v904_v30 = vadd.f32 %v882_v29, %v770_v7  ;;  %v2122_v33 = vpop.f32.mrb[25].mxu0  ;;  %v1016_v34 = vpop.f32.mrb[24].mxu1 }
 0x13b   : > { %v885_v35 = vpop.f32.mrb[26].mxu0  ;;  %v2150_v36 = vpop.f32.mrb[25].mxu1 }
 0x13c   : > { %v905_v37 = vadd.f32 %v885_v35, %v771_v11  ;;  %v1038_v39 = vadd.f32 %v1016_v34, %v904_v30  ;;  %v2123_v40 = vpop.f32.mrb[27].mxu0  ;;  %v1019_v41 = vpop.f32.mrb[26].mxu1 }
 0x13d   : > { %v2151_v42 = vpop.f32.mrb[27].mxu1 }
 0x13e   : > { %v1039_v45 = vadd.f32 %v1019_v41, %v905_v37  ;;  %v1870_v37 = vld [vmem:[%s2876_s2] ss:$0 sm:$0xff] }
 0x141   : > { %v890_v31 = vpop.f32.mrb[28].mxu0 }
 0x142   : > { %v906_v19 = vadd.f32 %v890_v31, %v772_v20  ;;  %v2126_v43 = vpop.f32.mrb[29].mxu0  ;;  %v1024_v46 = vpop.f32.mrb[28].mxu1 }
 0x143   : > { %v893_v47 = vpop.f32.mrb[30].mxu0  ;;  %v2154_v44 = vpop.f32.mrb[29].mxu1 }
 0x144   : > { %v907_v48 = vadd.f32 %v893_v47, %v773_v24  ;;  %v1040_v32 = vadd.f32 %v1024_v46, %v906_v19  ;;  %v1027_v49 = vpop.f32.mrb[30].mxu1  ;;  %v2127_v50 = vpop.f32.mrb[31].mxu0 }
 0x145   : > { %v2155_v51 = vpop.f32.mrb[31].mxu1 }
 0x146   : > { %v1041_v38 = vadd.f32 %v1027_v49, %v907_v48 }
 0x149   : > { %v898_v52 = vpop.f32.mrb[32].mxu0 }
 0x14a   : > { %v908_v53 = vadd.f32 %v898_v52, %v774_v61  ;;  %v1032_v56 = vpop.f32.mrb[32].mxu1  ;;  %v2130_v57 = vpop.f32.mrb[33].mxu0 }
 0x14b   : > { %v901_v59 = vpop.f32.mrb[34].mxu0  ;;  %v2158_v60 = vpop.f32.mrb[33].mxu1 }
 0x14c   : > { %v1042_v63 = vadd.f32 %v1032_v56, %v908_v53  ;;  %v2131_v2 = vpop.f32.mrb[35].mxu0  ;;  %v1035_v3 = vpop.f32.mrb[34].mxu1 }
 0x14d   : > { %v2159_v4 = vpop.f32.mrb[35].mxu1 }
 0x159   : > { %v1150_v5 = vpop.f32.mrb[36].mxu0 }
 0x15a   : > { %v1172_v6 = vadd.f32 %v1150_v5, %v1038_v39  ;;  %v2178_v7 = vpop.f32.mrb[37].mxu0  ;;  %v1284_v8 = vpop.f32.mrb[36].mxu1 }
 0x15b   : > { %v1153_v9 = vpop.f32.mrb[38].mxu0  ;;  %v2206_v10 = vpop.f32.mrb[37].mxu1  ;;  %v1871_v7 = vld [vmem:[%s2878_s4] ss:$0 sm:$0xff] }
 0x15c   : > { %v1173_v11 = vadd.f32 %v1153_v9, %v1039_v45  ;;  %v1306_v12 = vadd.f32 %v1284_v8, %v1172_v6  ;;  %v2179_v13 = vpop.f32.mrb[39].mxu0  ;;  %v1287_v14 = vpop.f32.mrb[38].mxu1  ;;  %v1592_v9 = vld [vmem:[%s2451_s15 + $0x8] sm:$0xff] }
 0x15d   : > { %v2207_v15 = vpop.f32.mrb[39].mxu1 }
 0x15e   : > { %v1307_v16 = vadd.f32 %v1287_v14, %v1173_v11 }
 0x161   : > { %v1158_v17 = vpop.f32.mrb[40].mxu0 }
 0x162   : > { %v1174_v18 = vadd.f32 %v1158_v17, %v1040_v32  ;;  %v2182_v20 = vpop.f32.mrb[41].mxu0  ;;  %v1292_v21 = vpop.f32.mrb[40].mxu1 }
 0x163   : > { %v1161_v22 = vpop.f32.mrb[42].mxu0  ;;  %v2210_v23 = vpop.f32.mrb[41].mxu1 }
 0x164   : > { %v1175_v24 = vadd.f32 %v1161_v22, %v1041_v38  ;;  %v1308_v25 = vadd.f32 %v1292_v21, %v1174_v18  ;;  %v1295_v26 = vpop.f32.mrb[42].mxu1  ;;  %v2183_v27 = vpop.f32.mrb[43].mxu0  ;;  %v1594_v18 = vld [vmem:[%s2451_s15 + $0x18] sm:$0xff]  ;;  %v1595_v23 = vld [vmem:[%s2451_s15 + $0x20] sm:$0xff] }
 0x165   : > { %v2211_v54 = vpop.f32.mrb[43].mxu1 }
 0x166   : > { %v1309_v55 = vadd.f32 %v1295_v26, %v1175_v24 }
 0x169   : > { %v1166_v58 = vpop.f32.mrb[44].mxu0 }
 0x16a   : > { %v1176_v61 = vadd.f32 %v1166_v58, %v1042_v63  ;;  %v1300_v62 = vpop.f32.mrb[44].mxu1  ;;  %v2186_v0 = vpop.f32.mrb[45].mxu0 }
 0x16b   : > { %v1169_v28 = vpop.f32.mrb[46].mxu0  ;;  %v2214_v29 = vpop.f32.mrb[45].mxu1 }
 0x16c   : > { %v1310_v30 = vadd.f32 %v1300_v62, %v1176_v61  ;;  %v2187_v33 = vpop.f32.mrb[47].mxu0  ;;  %v1303_v34 = vpop.f32.mrb[46].mxu1 }
 0x16d   : > { %v2215_v35 = vpop.f32.mrb[47].mxu1 }
 0x179   : > { %v1418_v36 = vpop.f32.mrb[48].mxu0 }
 0x17a   : > { %v1440_v39 = vadd.f32 %v1418_v36, %v1306_v12  ;;  %v2234_v40 = vpop.f32.mrb[49].mxu0  ;;  %v1593_v12 = vld [vmem:[%s2451_s15 + $0x10] sm:$0xff] }
 0x17b   : > { %v1421_v41 = vpop.f32.mrb[50].mxu0 }
 0x17c   : > { %v1452_v42 = vadd.f32 %v1870_v37, %v1440_v39  ;;  %v1441_v45 = vadd.f32 %v1421_v41, %v1307_v16  ;;  %v2235_v31 = vpop.f32.mrb[51].mxu0 }
 0x17e   : > { %v1453_v19 = vadd.f32 %v1870_v37, %v1441_v45  ;;  %v1457_v43 = vmax.f32 %v1452_v42, 0.0 }
 0x180   : > { %v1458_v46 = vmax.f32 %v1453_v19, 0.0 }
 0x181   : > { %v1426_v47 = vpop.f32.mrb[52].mxu0 }
 0x182   : > { %v1462_v44 = vpack.c.bf16 %v1458_v46, %v1457_v43  ;;  %v1442_v48 = vadd.f32 %v1426_v47, %v1308_v25  ;;  %v2238_v32 = vpop.f32.mrb[53].mxu0 }
 0x183   : > { %v1429_v49 = vpop.f32.mrb[54].mxu0 }
 0x184   : > { %v1454_v50 = vadd.f32 %v1870_v37, %v1442_v48  ;;  %v1443_v51 = vadd.f32 %v1429_v49, %v1309_v55  ;;  %v2239_v38 = vpop.f32.mrb[55].mxu0  ;;  %2261 = vmatmul.mubr.bf16.vlgmr.msra.gmra.mrb[48].mxu1 %v1462_v44  ;;  %v1596_v55 = vld [vmem:[%s2451_s15 + $0x28] sm:$0xff] }
 0x185   : > { %2264 = vmatprep.mubr.msk.bf16.mxu1 %vm2371_vm0, %v2370_v1 }
 0x186   : > { %v1455_v52 = vadd.f32 %v1870_v37, %v1443_v51  ;;  %v1459_v53 = vmax.f32 %v1454_v50, 0.0 }
 0x188   : > { %v1460_v56 = vmax.f32 %v1455_v52, 0.0 }
 0x189   : > { %v1434_v57 = vpop.f32.mrb[56].mxu0 }
 0x18a   : > { %v1444_v59 = vadd.f32 %v1434_v57, %v1310_v30  ;;  %v2242_v60 = vpop.f32.mrb[57].mxu0  ;;  %v1463_v63 = vpack.c.bf16 %v1460_v56, %v1459_v53 }
 0x18b   : > { %v1437_v2 = vpop.f32.mrb[58].mxu0 }
 0x18c   : > { %v1456_v3 = vadd.f32 %v1870_v37, %v1444_v59  ;;  %v2243_v4 = vpop.f32.mrb[59].mxu0  ;;  %2265 = vmatmul.mubr.bf16.gmra.mrb[52].mxu1 %v1463_v63 }
 0x18d   : > { %2268 = vmatprep.mubr.msk.bf16.mxu1 %vm2371_vm0, %v2370_v1 }
 0x18e   : > { %v1461_v5 = vmax.f32 %v1456_v3, 0.0 }
 0x190   : > { %v1464_v6 = vpack.c.bf16 %v1461_v5, %v1461_v5 }
 0x194   : > { %2269 = vmatmul.mubr.bf16.gmra.mrb[56].mxu1 %v1464_v6 }
 0x257   : > { %v1570_v8 = vpop.f32.mrb[48].mxu1 }
 0x258   : > { %v1571_v10 = vadd.f32 %v1871_v7, %v1570_v8  ;;  %v2262_v11 = vpop.f32.mrb[49].mxu1 }
 0x259   : > { %v1573_v1 = vpop.f32.mrb[50].mxu1 }
 0x25a   : > { %v1597_v13 = vadd.f32 %v1592_v9, %v1571_v10  ;;  %v1574_v14 = vadd.f32 %v1871_v7, %v1573_v1  ;;  %v2263_v15 = vpop.f32.mrb[51].mxu1 }
 0x25c   : > { %1602 = vst [vmem:[%s226_s13] sm:$0xff] %v1597_v13  ;;  %v1598_v16 = vadd.f32 %v1593_v12, %v1574_v14 }
 0x25e   : > { %1603 = vst [vmem:[%s226_s13 + $0x8] sm:$0xff] %v1598_v16 }
 0x25f   : > { %v1578_v17 = vpop.f32.mrb[52].mxu1 }
 0x260   : > { %v1579_v20 = vadd.f32 %v1871_v7, %v1578_v17  ;;  %v2266_v21 = vpop.f32.mrb[53].mxu1 }
 0x261   : > { %v1581_v22 = vpop.f32.mrb[54].mxu1 }
 0x262   : > { %v1599_v24 = vadd.f32 %v1594_v18, %v1579_v20  ;;  %v1582_v25 = vadd.f32 %v1871_v7, %v1581_v22  ;;  %v2267_v26 = vpop.f32.mrb[55].mxu1 }
 0x264   : > { %1604 = vst [vmem:[%s226_s13 + $0x10] sm:$0xff] %v1599_v24  ;;  %v1600_v27 = vadd.f32 %v1595_v23, %v1582_v25 }
 0x266   : > { %1605 = vst [vmem:[%s226_s13 + $0x18] sm:$0xff] %v1600_v27 }
 0x267   : > { %v1586_v54 = vpop.f32.mrb[56].mxu1 }
 0x268   : > { %v1587_v58 = vadd.f32 %v1871_v7, %v1586_v54  ;;  %v2270_v61 = vpop.f32.mrb[57].mxu1 }
 0x269   : > { %v1589_v62 = vpop.f32.mrb[58].mxu1 }
 0x26a   : > { %v1601_v0 = vadd.f32 %v1596_v55, %v1587_v58  ;;  %v2271_v28 = vpop.f32.mrb[59].mxu1 }
 0x26c   : > { %1606 = vst [vmem:[%s226_s13 + $0x20] sm:$0xff] %v1601_v0 }
 0x26d PF: > { %s15_s18 = sadd.s32 1, %s2368_s18  }
 0x26e   : > { %p12_p5 = scmp.ge.s32.totalorder %s15_s18, 4  }
 0x270   :  { %14 = sbr.rel (!%p12_p5) target bundleno = 1 (0x1), region = 78 }

</bundles_post_ra>
